<compile_context>
chip_gen: v5e
topology: v5e:2x2
jax: 0.10.0
libtpu: 0.0.40
codegen_flags: <defaults>
</compile_context>

<pallas_src>
import math
import functools

import jax
import jax.numpy as jnp
from jax.experimental import pallas as pl
from jax.experimental.pallas import tpu as pltpu  # noqa: F401  (TPU backend assumed)

_BN_EPS = 1e-5


def _round_up(x, m):
    return ((x + m - 1) // m) * m


# --------------------------- fused forward kernel ----------------------------
def _fused_gcn_kernel(num_stage,
                      x_ref, att1_ref, w1_ref, b1_ref,
                      atts_ref, ws_ref, bs_ref,
                      att7_ref, w7_ref, b7_ref,
                      out_ref):
    """Entire GCN forward in one invocation; everything resident in VMEM.

    x_ref      : (M, CLi_p)   activations, M = B * N_pad (batch folded in rows)
    att*_ref   : (M, M)       block-diagonal kron(I_B, att) adjacency
    w*_ref     : (CL_in, CL_out) Kronecker weight (eval-BN scale pre-folded)
    b*_ref     : (1, CL_out)
    atts/ws/bs : stacked params of the 2*num_stage residual-block layers
    """

    def gconv(att, w, b, h):
        # two MXU matmuls, f32 accumulation
        t = jnp.dot(h, w, preferred_element_type=jnp.float32)
        return jnp.dot(att, t, preferred_element_type=jnp.float32) + b

    x = x_ref[...]                                            # (M, CLi_p)

    # gc1 + folded eval-BN + tanh  (dropout = identity in eval mode)
    h = jnp.tanh(gconv(att1_ref[...], w1_ref[...], b1_ref[...], x))

    def block(s, h):
        r = h
        z = jnp.tanh(gconv(atts_ref[2 * s], ws_ref[2 * s], bs_ref[2 * s], h))
        z = jnp.tanh(gconv(atts_ref[2 * s + 1], ws_ref[2 * s + 1],
                           bs_ref[2 * s + 1], z))
        return z + r

    h = jax.lax.fori_loop(0, num_stage, block, h)

    # gc7 (no BN / tanh in the PyTorch forward) + global residual
    out_ref[...] = gconv(att7_ref[...], w7_ref[...], b7_ref[...], h) + x


# ------------------------- parameter preparation -----------------------------
def prepare_fused_params(params, batch, in_c, out_c, node_n, seq_len):
    """One-time prep: pad to lane/sublane-aligned shapes, fold the batch into a
    block-diagonal adjacency, and stack the residual-block layers."""
    L = seq_len
    cli, clh = in_c * L, out_c * L
    cli_p, clh_p = _round_up(cli, 128), _round_up(clh, 128)
    n_p = _round_up(node_n, 8)
    eye_b = jnp.eye(batch, dtype=jnp.float32)

    def pad_att(att):
        a = jnp.zeros((n_p, n_p), jnp.float32).at[:node_n, :node_n].set(att)
        return jnp.kron(eye_b, a)                           # (B*n_p, B*n_p)

    def pad_w(w, ci_p, co_p):
        return jnp.zeros((ci_p, co_p), jnp.float32).at[:w.shape[0], :w.shape[1]].set(w)

    def pad_b(b, co_p):
        b = b.reshape(1, -1)
        return jnp.zeros((1, co_p), jnp.float32).at[:, :b.shape[-1]].set(b)

    blk_layers = []
    for blk in params["gcbs"]:
        blk_layers += [blk["gc1"], blk["gc2"]]

    if blk_layers:
        atts = jnp.stack([pad_att(l["att"]) for l in blk_layers])
        ws = jnp.stack([pad_w(l["w_comb"], clh_p, clh_p) for l in blk_layers])
        bs = jnp.stack([pad_b(l["bias_comb"], clh_p) for l in blk_layers])
    else:  # keep the kernel signature stable when num_stage == 0 (never read)
        atts = jnp.zeros((1, batch * n_p, batch * n_p), jnp.float32)
        ws = jnp.zeros((1, clh_p, clh_p), jnp.float32)
        bs = jnp.zeros((1, 1, clh_p), jnp.float32)

    return {
        "att1": pad_att(params["gc1"]["att"]),
        "w1": pad_w(params["gc1"]["w_comb"], cli_p, clh_p),
        "b1": pad_b(params["gc1"]["bias_comb"], clh_p),
        "atts": atts, "ws": ws, "bs": bs,
        "att7": pad_att(params["gc7"]["att"]),
        "w7": pad_w(params["gc7"]["w_comb"], clh_p, cli_p),
        "b7": pad_b(params["gc7"]["bias_comb"], cli_p),
    }


# ----------------------------- forward wrapper --------------------------------
@functools.partial(jax.jit, static_argnames=("in_c", "out_c", "node_n",
                                             "seq_len", "num_stage"))
def gcn_forward(x, fused, *, in_c, out_c, node_n, seq_len, num_stage):
    """x: (B, in_c, node_n, seq_len) — PyTorch layout. Returns the same layout."""
    B = x.shape[0]
    L = seq_len
    cli, clh = in_c * L, out_c * L
    cli_p, clh_p = _round_up(cli, 128), _round_up(clh, 128)
    n_p = _round_up(node_n, 8)
    m = B * n_p

    # boundary permute -> lane-dense, padded (B*N_pad, Cin*L_pad). This lives in
    # the same jitted XLA program as the pallas_call (no standalone dispatch).
    x_flat = x.transpose(0, 2, 1, 3).reshape(B, node_n, cli)
    x_flat = jnp.pad(x_flat, ((0, 0), (0, n_p - node_n), (0, cli_p - cli)))
    x_flat = x_flat.reshape(m, cli_p)

    # advisory cost hint so XLA schedules the tiny custom call tightly
    n_blk = 2 * num_stage
    flops = (2 * m * cli_p * clh_p + 2 * m * m * clh_p
             + n_blk * (2 * m * clh_p * clh_p + 2 * m * m * clh_p)
             + 2 * m * clh_p * cli_p + 2 * m * m * cli_p)
    transc = m * clh_p * (1 + n_blk)
    bytes_acc = 4 * (x_flat.size + m * cli_p
                     + sum(v.size for v in jax.tree_util.tree_leaves(fused)))

    kernel = functools.partial(_fused_gcn_kernel, num_stage)
    out_flat = pl.pallas_call(
        kernel,
        out_shape=jax.ShapeDtypeStruct((m, cli_p), jnp.float32),
        cost_estimate=pl.CostEstimate(flops=int(flops),
                                      transcendentals=int(transc),
                                      bytes_accessed=int(bytes_acc)),
    )(x_flat, fused["att1"], fused["w1"], fused["b1"],
      fused["atts"], fused["ws"], fused["bs"],
      fused["att7"], fused["w7"], fused["b7"])

    out = out_flat.reshape(B, n_p, cli_p)[:, :node_n, :cli]
    return out.reshape(B, node_n, in_c, L).transpose(0, 2, 1, 3)


# ----------------------------- parameter setup --------------------------------
def init_graph_conv(key, in_c, out_c, node_n, seq_len, fold_bn=False):
    stdv = 1.0 / math.sqrt(node_n)  # matches reset_parameters (att.size(1))
    k1, k2, k3, k4 = jax.random.split(key, 4)
    u = lambda k, shape: jax.random.uniform(k, shape, jnp.float32, -stdv, stdv)
    att = u(k1, (node_n, node_n))
    w_seq = u(k2, (seq_len, seq_len))
    w_c = u(k3, (in_c, out_c))
    bias = u(k4, (seq_len,))

    # Kronecker precompute: W_comb[c*L+t, o*L+l] = W_c[c,o] * W_seq[t,l]
    w_comb = jnp.kron(w_c, w_seq)                # (in_c*L, out_c*L)
    bias_comb = jnp.tile(bias, out_c)            # (out_c*L,)

    if fold_bn:
        # eval-mode BatchNorm1d with fresh running stats:
        # gamma=1, beta=0, mean=0, var=1  ->  y = x / sqrt(1 + eps)
        s = 1.0 / math.sqrt(1.0 + _BN_EPS)
        w_comb = w_comb * s
        bias_comb = bias_comb * s

    return {
        # raw params kept for the pure-JAX reference
        "att": att, "weight_seq": w_seq, "weight_c": w_c, "bias": bias,
        # fused-kernel params
        "w_comb": w_comb,
        "bias_comb": bias_comb.reshape(1, out_c * seq_len),
    }


def init_gcn(key, in_c, out_c, node_n, seq_len, num_stage):
    keys = jax.random.split(key, 2 + 2 * num_stage)
    params = {
        "gc1": init_graph_conv(keys[0], in_c, out_c, node_n, seq_len, fold_bn=True),
        "gcbs": [],
        "gc7": init_graph_conv(keys[1], out_c, in_c, node_n, seq_len, fold_bn=False),
    }
    for i in range(num_stage):
        params["gcbs"].append({
            "gc1": init_graph_conv(keys[2 + 2 * i], out_c, out_c, node_n, seq_len,
                                   fold_bn=True),
            "gc2": init_graph_conv(keys[3 + 2 * i], out_c, out_c, node_n, seq_len,
                                   fold_bn=True),
        })
    return params


# --------------------------- pure-JAX reference --------------------------------
def _graph_conv_ref(x, p):
    out = jnp.einsum(
        "nm,bcmt,co,tl->bonl",
        p["att"], x, p["weight_c"], p["weight_seq"],
        precision=jax.lax.Precision.HIGHEST,
    )
    return out + p["bias"]


def _gcn_ref(x, params):
    s = 1.0 / math.sqrt(1.0 + _BN_EPS)   # eval-mode BN affine
    bn_tanh = lambda v: jnp.tanh(v * s)

    y = bn_tanh(_graph_conv_ref(x, params["gc1"]))
    for blk in params["gcbs"]:
        r = y
        z = bn_tanh(_graph_conv_ref(y, blk["gc1"]))
        z = bn_tanh(_graph_conv_ref(z, blk["gc2"]))
        y = z + r
    return _graph_conv_ref(y, params["gc7"]) + x


if __name__ == "__main__":
    B, in_c, out_c, node_n, seq_len, num_stage = 2, 4, 8, 22, 20, 1
    key = jax.random.PRNGKey(0)
    kp, kx = jax.random.split(key)
    params = init_gcn(kp, in_c, out_c, node_n, seq_len, num_stage)
    fused = prepare_fused_params(params, B, in_c, out_c, node_n, seq_len)
    x = jax.random.normal(kx, (B, in_c, node_n, seq_len), jnp.float32)

    y = jax.block_until_ready(gcn_forward(
        x, fused, in_c=in_c, out_c=out_c, node_n=node_n,
        seq_len=seq_len, num_stage=num_stage))
    y_ref = jax.block_until_ready(_gcn_ref(x, params))

    assert y.shape == (B, in_c, node_n, seq_len), y.shape
    max_err = float(jnp.max(jnp.abs(y - y_ref)))
    assert jnp.allclose(y, y_ref, atol=2e-2, rtol=2e-2), f"max_err={max_err}"
    print("KERNEL_OK")
</pallas_src>

<mosaic_0001>
module attributes {stable_mosaic.version = 11 : i64} {
  func.func @_fused_gcn_kernel(%arg0: memref<48x128xf32, #tpu.memory_space<vmem>>, %arg1: memref<48x48xf32, #tpu.memory_space<vmem>>, %arg2: memref<128x256xf32, #tpu.memory_space<vmem>>, %arg3: memref<1x256xf32, #tpu.memory_space<vmem>>, %arg4: memref<2x48x48xf32, #tpu.memory_space<vmem>>, %arg5: memref<2x256x256xf32, #tpu.memory_space<vmem>>, %arg6: memref<2x1x256xf32, #tpu.memory_space<vmem>>, %arg7: memref<48x48xf32, #tpu.memory_space<vmem>>, %arg8: memref<256x128xf32, #tpu.memory_space<vmem>>, %arg9: memref<1x128xf32, #tpu.memory_space<vmem>>, %arg10: memref<48x128xf32, #tpu.memory_space<vmem>>) attributes {dimension_semantics = [], scalar_prefetch = 0 : i64, scratch_operands = 0 : i64, tpu.core_type = #tpu.core_type<tc>} {
    %c0 = arith.constant 0 : index
    %c0_0 = arith.constant 0 : index
    %0 = vector.load %arg0[%c0, %c0_0] : memref<48x128xf32, #tpu.memory_space<vmem>>, vector<48x128xf32>
    %c0_1 = arith.constant 0 : index
    %c0_2 = arith.constant 0 : index
    %1 = vector.load %arg1[%c0_1, %c0_2] : memref<48x48xf32, #tpu.memory_space<vmem>>, vector<48x48xf32>
    %c0_3 = arith.constant 0 : index
    %c0_4 = arith.constant 0 : index
    %2 = vector.load %arg2[%c0_3, %c0_4] : memref<128x256xf32, #tpu.memory_space<vmem>>, vector<128x256xf32>
    %c0_5 = arith.constant 0 : index
    %c0_6 = arith.constant 0 : index
    %3 = vector.load %arg3[%c0_5, %c0_6] : memref<1x256xf32, #tpu.memory_space<vmem>>, vector<1x256xf32>
    %cst = arith.constant dense<0.000000e+00> : vector<48x256xf32>
    %4 = tpu.matmul %0, %2, %cst {dimension_numbers = #tpu.dot_dimension_numbers<[1], [0], [0], [1], [0, 0, 1, 1], [], []>} : vector<48x128xf32>, vector<128x256xf32>, vector<48x256xf32> -> vector<48x256xf32>
    %cst_7 = arith.constant dense<0.000000e+00> : vector<48x256xf32>
    %5 = tpu.matmul %1, %4, %cst_7 {dimension_numbers = #tpu.dot_dimension_numbers<[1], [0], [0], [1], [0, 0, 1, 1], [], []>} : vector<48x48xf32>, vector<48x256xf32>, vector<48x256xf32> -> vector<48x256xf32>
    %6 = vector.broadcast %3 : vector<1x256xf32> to vector<48x256xf32>
    %7 = arith.addf %5, %6 : vector<48x256xf32>
    %8 = math.tanh %7 : vector<48x256xf32>
    %c0_i32 = arith.constant 0 : i32
    %c2_i32 = arith.constant 2 : i32
    %9 = arith.muli %c2_i32, %c0_i32 : i32
    %10 = arith.index_cast %9 : i32 to index
    %c0_8 = arith.constant 0 : index
    %c0_9 = arith.constant 0 : index
    %11 = vector.load %arg4[%10, %c0_8, %c0_9] : memref<2x48x48xf32, #tpu.memory_space<vmem>>, vector<1x48x48xf32>
    %12 = vector.shape_cast %11 : vector<1x48x48xf32> to vector<48x48xf32>
    %c2_i32_10 = arith.constant 2 : i32
    %13 = arith.muli %c2_i32_10, %c0_i32 : i32
    %14 = arith.index_cast %13 : i32 to index
    %c0_11 = arith.constant 0 : index
    %c0_12 = arith.constant 0 : index
    %15 = vector.load %arg5[%14, %c0_11, %c0_12] : memref<2x256x256xf32, #tpu.memory_space<vmem>>, vector<1x256x256xf32>
    %16 = vector.shape_cast %15 : vector<1x256x256xf32> to vector<256x256xf32>
    %c2_i32_13 = arith.constant 2 : i32
    %17 = arith.muli %c2_i32_13, %c0_i32 : i32
    %18 = arith.index_cast %17 : i32 to index
    %c0_14 = arith.constant 0 : index
    %c0_15 = arith.constant 0 : index
    %19 = vector.load %arg6[%18, %c0_14, %c0_15] : memref<2x1x256xf32, #tpu.memory_space<vmem>>, vector<1x1x256xf32>
    %20 = vector.shape_cast %19 : vector<1x1x256xf32> to vector<1x256xf32>
    %cst_16 = arith.constant dense<0.000000e+00> : vector<48x256xf32>
    %21 = tpu.matmul %8, %16, %cst_16 {dimension_numbers = #tpu.dot_dimension_numbers<[1], [0], [0], [1], [0, 0, 1, 1], [], []>} : vector<48x256xf32>, vector<256x256xf32>, vector<48x256xf32> -> vector<48x256xf32>
    %cst_17 = arith.constant dense<0.000000e+00> : vector<48x256xf32>
    %22 = tpu.matmul %12, %21, %cst_17 {dimension_numbers = #tpu.dot_dimension_numbers<[1], [0], [0], [1], [0, 0, 1, 1], [], []>} : vector<48x48xf32>, vector<48x256xf32>, vector<48x256xf32> -> vector<48x256xf32>
    %23 = vector.broadcast %20 : vector<1x256xf32> to vector<48x256xf32>
    %24 = arith.addf %22, %23 : vector<48x256xf32>
    %25 = math.tanh %24 : vector<48x256xf32>
    %c2_i32_18 = arith.constant 2 : i32
    %26 = arith.muli %c2_i32_18, %c0_i32 : i32
    %c1_i32 = arith.constant 1 : i32
    %27 = arith.addi %26, %c1_i32 : i32
    %28 = arith.index_cast %27 : i32 to index
    %c0_19 = arith.constant 0 : index
    %c0_20 = arith.constant 0 : index
    %29 = vector.load %arg4[%28, %c0_19, %c0_20] : memref<2x48x48xf32, #tpu.memory_space<vmem>>, vector<1x48x48xf32>
    %30 = vector.shape_cast %29 : vector<1x48x48xf32> to vector<48x48xf32>
    %c2_i32_21 = arith.constant 2 : i32
    %31 = arith.muli %c2_i32_21, %c0_i32 : i32
    %c1_i32_22 = arith.constant 1 : i32
    %32 = arith.addi %31, %c1_i32_22 : i32
    %33 = arith.index_cast %32 : i32 to index
    %c0_23 = arith.constant 0 : index
    %c0_24 = arith.constant 0 : index
    %34 = vector.load %arg5[%33, %c0_23, %c0_24] : memref<2x256x256xf32, #tpu.memory_space<vmem>>, vector<1x256x256xf32>
    %35 = vector.shape_cast %34 : vector<1x256x256xf32> to vector<256x256xf32>
    %c2_i32_25 = arith.constant 2 : i32
    %36 = arith.muli %c2_i32_25, %c0_i32 : i32
    %c1_i32_26 = arith.constant 1 : i32
    %37 = arith.addi %36, %c1_i32_26 : i32
    %38 = arith.index_cast %37 : i32 to index
    %c0_27 = arith.constant 0 : index
    %c0_28 = arith.constant 0 : index
    %39 = vector.load %arg6[%38, %c0_27, %c0_28] : memref<2x1x256xf32, #tpu.memory_space<vmem>>, vector<1x1x256xf32>
    %40 = vector.shape_cast %39 : vector<1x1x256xf32> to vector<1x256xf32>
    %cst_29 = arith.constant dense<0.000000e+00> : vector<48x256xf32>
    %41 = tpu.matmul %25, %35, %cst_29 {dimension_numbers = #tpu.dot_dimension_numbers<[1], [0], [0], [1], [0, 0, 1, 1], [], []>} : vector<48x256xf32>, vector<256x256xf32>, vector<48x256xf32> -> vector<48x256xf32>
    %cst_30 = arith.constant dense<0.000000e+00> : vector<48x256xf32>
    %42 = tpu.matmul %30, %41, %cst_30 {dimension_numbers = #tpu.dot_dimension_numbers<[1], [0], [0], [1], [0, 0, 1, 1], [], []>} : vector<48x48xf32>, vector<48x256xf32>, vector<48x256xf32> -> vector<48x256xf32>
    %43 = vector.broadcast %40 : vector<1x256xf32> to vector<48x256xf32>
    %44 = arith.addf %42, %43 : vector<48x256xf32>
    %45 = math.tanh %44 : vector<48x256xf32>
    %46 = arith.addf %45, %8 : vector<48x256xf32>
    %c1_i32_31 = arith.constant 1 : i32
    %c0_32 = arith.constant 0 : index
    %c0_33 = arith.constant 0 : index
    %47 = vector.load %arg7[%c0_32, %c0_33] : memref<48x48xf32, #tpu.memory_space<vmem>>, vector<48x48xf32>
    %c0_34 = arith.constant 0 : index
    %c0_35 = arith.constant 0 : index
    %48 = vector.load %arg8[%c0_34, %c0_35] : memref<256x128xf32, #tpu.memory_space<vmem>>, vector<256x128xf32>
    %c0_36 = arith.constant 0 : index
    %c0_37 = arith.constant 0 : index
    %49 = vector.load %arg9[%c0_36, %c0_37] : memref<1x128xf32, #tpu.memory_space<vmem>>, vector<1x128xf32>
    %cst_38 = arith.constant dense<0.000000e+00> : vector<48x128xf32>
    %50 = tpu.matmul %46, %48, %cst_38 {dimension_numbers = #tpu.dot_dimension_numbers<[1], [0], [0], [1], [0, 0, 1, 1], [], []>} : vector<48x256xf32>, vector<256x128xf32>, vector<48x128xf32> -> vector<48x128xf32>
    %cst_39 = arith.constant dense<0.000000e+00> : vector<48x128xf32>
    %51 = tpu.matmul %47, %50, %cst_39 {dimension_numbers = #tpu.dot_dimension_numbers<[1], [0], [0], [1], [0, 0, 1, 1], [], []>} : vector<48x48xf32>, vector<48x128xf32>, vector<48x128xf32> -> vector<48x128xf32>
    %52 = vector.broadcast %49 : vector<1x128xf32> to vector<48x128xf32>
    %53 = arith.addf %51, %52 : vector<48x128xf32>
    %54 = arith.addf %53, %0 : vector<48x128xf32>
    %c0_40 = arith.constant 0 : index
    %c0_41 = arith.constant 0 : index
    %55 = vector.load %arg10[%c0_40, %c0_41] : memref<48x128xf32, #tpu.memory_space<vmem>>, vector<48x128xf32>
    tpu.vector_store %arg10[%c0_40, %c0_41], %54 {strides = array<i32>} : memref<48x128xf32, #tpu.memory_space<vmem>>, vector<48x128xf32>,
    return
  }
}

</mosaic_0001>

<bundles_post_ra>
// kernel: gcn_forward.1
= control target key start
LH: loop header
LB: loop body
LE: loop exit
PB: predicated region body
PF: predicated region fallthrough
CT: control target
= control target key end

     0   :  { %15 = vsyncpa [#allocation3], 0  ;;  %s1860_s0 = inlined_call_operand.vmem [shape: f32[48,128], index: 0, kind: input, shape index: {}]   ;;  %s1861_s1 = inlined_call_operand.vmem [shape: f32[48,48], index: 1, kind: input, shape index: {}]   ;;  %s1862_s2 = inlined_call_operand.vmem [shape: f32[128,256], index: 2, kind: input, shape index: {}]   ;;  %s1863_s3 = inlined_call_operand.hbm [shape: f32[1,256], index: 3, kind: input, shape index: {}]   ;;  %s1864_s4 = inlined_call_operand.vmem [shape: f32[2,48,48], index: 4, kind: input, shape index: {}]   ;;  %s1865_s5 = inlined_call_operand.hbm [shape: f32[2,256,256], index: 5, kind: input, shape index: {}]   ;;  %s1866_s6 = inlined_call_operand.vmem [shape: f32[2,1,256], index: 6, kind: input, shape index: {}]   ;;  %s1867_s7 = inlined_call_operand.hbm [shape: f32[48,48], index: 7, kind: input, shape index: {}]   ;;  %s1868_s8 = inlined_call_operand.vmem [shape: f32[256,128], index: 8, kind: input, shape index: {}]   ;;  %s1869_s9 = inlined_call_operand.vmem [shape: f32[1,128], index: 9, kind: input, shape index: {}]   ;;  %s1870_s10 = inlined_call_operand.vmem [shape: f32[48,128], index: 10, kind: output, shape index: {}]  }
   0x1   :  { %16 = vsyncpa [#allocation5], 0  ;;  %s40_s15 = sshll.u32 %s1865_s5, 4  ;;  %s1358_s16 = smov [#allocation4]   ;;  %s41_s15 = int_to_ptr.hbm [resolvable:$true] %s40_s15 }
   0x2   :  { %s42_s17 = sshll.u32 %s1358_s16, 4  ;;  %s28_s20 = sshll.u32 %s1863_s3, 4  ;;  %s43_s17 = int_to_ptr.vmem [resolvable:$true] %s42_s17  ;;  %s29_s20 = int_to_ptr.hbm [resolvable:$true] %s28_s20 }
   0x3   :  { %s1359_s21 = smov 256   ;;  %s1360_s22 = smov 16  }
   0x4   :  { %48 = dma.hbm_to_vmem [thread:$0]  %s41_s15, 16384, %s43_s17, [#allocation5], %s1359_s21, %s1359_s21, %s1360_s22  }
   0x5   :  { %s1361_s23 = smov [#allocation2]   ;;  %s55_s27 = sshll.u32 %s1867_s7, 4  ;;  %s56_s27 = int_to_ptr.hbm [resolvable:$true] %s55_s27 }
   0x6   :  { %s30_s24 = sshll.u32 %s1361_s23, 4  ;;  %s1362_s5 = smov [#allocation6]   ;;  %s31_s24 = int_to_ptr.vmem [resolvable:$true] %s30_s24 }
   0x7   :  { %33 = dma.hbm_to_vmem [thread:$0]  %s29_s20, 32, %s31_s24, [#allocation3]  }
   0x8   :  { %s57_s28 = sshll.u32 %s1362_s5, 4  ;;  %s1363_s29 = smov 128   ;;  %s58_s28 = int_to_ptr.vmem [resolvable:$true] %s57_s28 }
   0x9   :  { %s1364_s30 = smov 8  }
   0xa   :  { %63 = dma.hbm_to_vmem [thread:$0]  %s56_s27, 768, %s58_s28, [#allocation5], %s1363_s29, %s1363_s29, %s1364_s30  }
   0xb   :  { %1354 = dma.done.wait [#allocation3], 32  }
   0xc   :  { %1355 = vsyncadd [#allocation3], 4294967264 }
   0xd   :  { %1356 = dma.done.wait [#allocation5], 17152  }
   0xe   :  { %1357 = vsyncadd [#allocation5], 4294950144  ;;  %v122_v0 = vld [vmem:[%s1862_s2 + $0xf0] sm:$0xff]  ;;  %v120_v1 = vld [vmem:[%s1862_s2 + $0xe0] sm:$0xff]  ;;  %vm200_vm0 = vcmask 392192  }
   0xf   :  { %1180 = vmatpush.msra.mxu1 %v122_v0  ;;  %125 = vmatpush.msra.mxu0 %v122_v0  ;;  %v118_v2 = vld [vmem:[%s1862_s2 + $0xd0] sm:$0xff]  ;;  %v116_v3 = vld [vmem:[%s1862_s2 + $0xc0] sm:$0xff]  ;;  %v123_v16 = vld [vmem:[%s1862_s2 + $0xf8] sm:$0xff] }
  0x10   :  { %v114_v4 = vld [vmem:[%s1862_s2 + $0xb0] sm:$0xff]  ;;  %v112_v5 = vld [vmem:[%s1862_s2 + $0xa0] sm:$0xff]  ;;  %v121_v19 = vld [vmem:[%s1862_s2 + $0xe8] sm:$0xff] }
  0x11   :  { %1181 = vmatpush.msra.mxu1 %v120_v1  ;;  %126 = vmatpush.msra.mxu0 %v120_v1  ;;  %v110_v6 = vld [vmem:[%s1862_s2 + $0x90] sm:$0xff]  ;;  %v108_v7 = vld [vmem:[%s1862_s2 + $0x80] sm:$0xff]  ;;  %v119_v20 = vld [vmem:[%s1862_s2 + $0xd8] sm:$0xff] }
  0x12   :  { %v106_v8 = vld [vmem:[%s1862_s2 + $0x70] sm:$0xff]  ;;  %v104_v9 = vld [vmem:[%s1862_s2 + $0x60] sm:$0xff]  ;;  %v117_v21 = vld [vmem:[%s1862_s2 + $0xc8] sm:$0xff] }
  0x13   :  { %1182 = vmatpush.msra.mxu1 %v118_v2  ;;  %127 = vmatpush.msra.mxu0 %v118_v2  ;;  %v102_v10 = vld [vmem:[%s1862_s2 + $0x50] sm:$0xff]  ;;  %v100_v11 = vld [vmem:[%s1862_s2 + $0x40] sm:$0xff]  ;;  %v115_v22 = vld [vmem:[%s1862_s2 + $0xb8] sm:$0xff] }
  0x14   :  { %v98_v12 = vld [vmem:[%s1862_s2 + $0x30] sm:$0xff]  ;;  %v96_v13 = vld [vmem:[%s1862_s2 + $0x20] sm:$0xff]  ;;  %v81_v23 = vld [vmem:[%s1860_s0 + $0x8] sm:$0xff] }
  0x15   :  { %1183 = vmatpush.msra.mxu1 %v116_v3  ;;  %128 = vmatpush.msra.mxu0 %v116_v3  ;;  %v94_v14 = vld [vmem:[%s1862_s2 + $0x10] sm:$0xff]  ;;  %v92_v15 = vld [vmem:[%s1862_s2] sm:$0xff]  ;;  %v85_v24 = vld [vmem:[%s1860_s0 + $0x28] sm:$0xff] }
  0x16   :  { %v80_v17 = vld [vmem:[%s1860_s0] sm:$0xff]  ;;  %v113_v25 = vld [vmem:[%s1862_s2 + $0xa8] sm:$0xff]  ;;  %v111_v26 = vld [vmem:[%s1862_s2 + $0x98] sm:$0xff] }
  0x17   :  { %1184 = vmatpush.msra.mxu1 %v114_v4  ;;  %129 = vmatpush.msra.mxu0 %v114_v4  ;;  %v84_v18 = vld [vmem:[%s1860_s0 + $0x20] sm:$0xff]  ;;  %v109_v27 = vld [vmem:[%s1862_s2 + $0x88] sm:$0xff]  ;;  %v107_v28 = vld [vmem:[%s1862_s2 + $0x78] sm:$0xff] }
  0x18   :  { %v82_v29 = vld [vmem:[%s1860_s0 + $0x10] sm:$0xff]  ;;  %v105_v30 = vld [vmem:[%s1862_s2 + $0x68] sm:$0xff]  ;;  %v103_v31 = vld [vmem:[%s1862_s2 + $0x58] sm:$0xff] }
  0x19   :  { %1185 = vmatpush.msra.mxu1 %v112_v5  ;;  %130 = vmatpush.msra.mxu0 %v112_v5  ;;  %v101_v32 = vld [vmem:[%s1862_s2 + $0x48] sm:$0xff]  ;;  %v99_v33 = vld [vmem:[%s1862_s2 + $0x38] sm:$0xff]  ;;  %v86_v47 = vld [vmem:[%s1861_s1] sm:$0xff] }
  0x1a   :  { %v83_v34 = vld [vmem:[%s1860_s0 + $0x18] sm:$0xff]  ;;  %v97_v35 = vld [vmem:[%s1862_s2 + $0x28] sm:$0xff]  ;;  %v88_v51 = vld [vmem:[%s1861_s1 + $0x10] sm:$0xff] }
  0x1b   :  { %1186 = vmatpush.msra.mxu1 %v110_v6  ;;  %131 = vmatpush.msra.mxu0 %v110_v6  ;;  %v95_v36 = vld [vmem:[%s1862_s2 + $0x18] sm:$0xff]  ;;  %v93_v37 = vld [vmem:[%s1862_s2 + $0x8] sm:$0xff]  ;;  %v1565_v54 = vld [vmem:[%s1861_s1 + $0x20] sm:$0xff] }
  0x1c   :  { %v87_v49 = vld [vmem:[%s1861_s1 + $0x8] sm:$0xff]  ;;  %v1558_v53 = vld [vmem:[%s1861_s1 + $0x18] sm:$0xff] }
  0x1d   :  { %1187 = vmatpush.msra.mxu1 %v108_v7  ;;  %132 = vmatpush.msra.mxu0 %v108_v7  ;;  %v1573_v55 = vld [vmem:[%s1861_s1 + $0x28] sm:$0xff]  ;;  %v337_v56 = vld [vmem:[#allocation4 + $0xf0] sm:$0xff]  ;;  %v338_v58 = vld [vmem:[#allocation4 + $0xf8] sm:$0xff] }
  0x1e   :  { %v369_v57 = vld [vmem:[#allocation4 + $0x1f0] sm:$0xff]  ;;  %v370_v59 = vld [vmem:[#allocation4 + $0x1f8] sm:$0xff]  ;;  %v335_v60 = vld [vmem:[#allocation4 + $0xe0] sm:$0xff] }
  0x1f   :  { %1188 = vmatpush.msra.mxu1 %v106_v8  ;;  %133 = vmatpush.msra.mxu0 %v106_v8  ;;  %v367_v61 = vld [vmem:[#allocation4 + $0x1e0] sm:$0xff]  ;;  %v336_v62 = vld [vmem:[#allocation4 + $0xe8] sm:$0xff]  ;;  %v333_v0 = vld [vmem:[#allocation4 + $0xd0] sm:$0xff] }
  0x20   :  { %v368_v63 = vld [vmem:[#allocation4 + $0x1e8] sm:$0xff]  ;;  %v365_v1 = vld [vmem:[#allocation4 + $0x1d0] sm:$0xff]  ;;  %v334_v2 = vld [vmem:[#allocation4 + $0xd8] sm:$0xff] }
  0x21   :  { %1189 = vmatpush.msra.mxu1 %v104_v9  ;;  %134 = vmatpush.msra.mxu0 %v104_v9  ;;  %v366_v3 = vld [vmem:[#allocation4 + $0x1d8] sm:$0xff]  ;;  %v331_v4 = vld [vmem:[#allocation4 + $0xc0] sm:$0xff]  ;;  %v332_v6 = vld [vmem:[#allocation4 + $0xc8] sm:$0xff] }
  0x22   :  { %v363_v5 = vld [vmem:[#allocation4 + $0x1c0] sm:$0xff]  ;;  %v364_v7 = vld [vmem:[#allocation4 + $0x1c8] sm:$0xff]  ;;  %v329_v8 = vld [vmem:[#allocation4 + $0xb0] sm:$0xff] }
  0x23   :  { %1190 = vmatpush.msra.mxu1 %v102_v10  ;;  %135 = vmatpush.msra.mxu0 %v102_v10  ;;  %v361_v9 = vld [vmem:[#allocation4 + $0x1b0] sm:$0xff]  ;;  %v330_v10 = vld [vmem:[#allocation4 + $0xb8] sm:$0xff] }
  0x25   :  { %1191 = vmatpush.msra.mxu1 %v100_v11  ;;  %136 = vmatpush.msra.mxu0 %v100_v11  ;;  %v362_v11 = vld [vmem:[#allocation4 + $0x1b8] sm:$0xff] }
  0x27   :  { %1192 = vmatpush.msra.mxu1 %v98_v12  ;;  %137 = vmatpush.msra.mxu0 %v98_v12  ;;  %v327_v12 = vld [vmem:[#allocation4 + $0xa0] sm:$0xff] }
  0x29   :  { %1193 = vmatpush.msra.mxu1 %v96_v13  ;;  %138 = vmatpush.msra.mxu0 %v96_v13  ;;  %v359_v13 = vld [vmem:[#allocation4 + $0x1a0] sm:$0xff] }
  0x2b   :  { %1194 = vmatpush.msra.mxu1 %v94_v14  ;;  %139 = vmatpush.msra.mxu0 %v94_v14  ;;  %v328_v14 = vld [vmem:[#allocation4 + $0xa8] sm:$0xff] }
  0x2d   :  { %1195 = vmatpush.msra.mxu1 %v92_v15  ;;  %140 = vmatpush.msra.mxu0 %v92_v15  ;;  %v360_v15 = vld [vmem:[#allocation4 + $0x1a8] sm:$0xff] }
  0x2e   :  { %141 = vmatmul.f32.vlgmr.msra.gmra.mxu0 %v80_v17  ;;  %153 = vmatmul.f32.vlgmr.msra.gmra.mxu1 %v84_v18 }
  0x2f   :  { %160 = vmatpush.msrb.mxu1 %v123_v16  ;;  %442 = vmatpush.msrb.mxu0 %v338_v58  ;;  %v325_v16 = vld [vmem:[#allocation4 + $0x90] sm:$0xff]  ;;  %v339_v58 = vld [vmem:[#allocation4 + $0x100] sm:$0xff] }
  0x31   :  { %161 = vmatpush.msrb.mxu1 %v121_v19  ;;  %443 = vmatpush.msrb.mxu0 %v336_v62  ;;  %v358_v19 = vld [vmem:[#allocation4 + $0x198] sm:$0xff]  ;;  %v340_v62 = vld [vmem:[#allocation4 + $0x108] sm:$0xff] }
  0x33   :  { %162 = vmatpush.msrb.mxu1 %v119_v20  ;;  %444 = vmatpush.msrb.mxu0 %v334_v2  ;;  %v323_v20 = vld [vmem:[#allocation4 + $0x80] sm:$0xff] }
  0x35   :  { %163 = vmatpush.msrb.mxu1 %v117_v21  ;;  %445 = vmatpush.msrb.mxu0 %v332_v6  ;;  %v324_v21 = vld [vmem:[#allocation4 + $0x88] sm:$0xff] }
  0x36   :  { %144 = vmatmul.f32.gmra.mxu0 %v81_v23  ;;  %156 = vmatmul.f32.gmra.mxu1 %v85_v24 }
  0x37   :  { %164 = vmatpush.msrb.mxu1 %v115_v22  ;;  %446 = vmatpush.msrb.mxu0 %v330_v10  ;;  %v355_v22 = vld [vmem:[#allocation4 + $0x180] sm:$0xff] }
  0x39   :  { %165 = vmatpush.msrb.mxu1 %v113_v25  ;;  %447 = vmatpush.msrb.mxu0 %v328_v14  ;;  %v322_v25 = vld [vmem:[#allocation4 + $0x78] sm:$0xff] }
  0x3b   :  { %166 = vmatpush.msrb.mxu1 %v111_v26  ;;  %v353_v26 = vld [vmem:[#allocation4 + $0x170] sm:$0xff] }
  0x3d   :  { %167 = vmatpush.msrb.mxu1 %v109_v27  ;;  %v354_v27 = vld [vmem:[#allocation4 + $0x178] sm:$0xff] }
  0x3e   :  { %147 = vmatmul.f32.gmra.mxu0 %v82_v29 }
  0x3f   :  { %168 = vmatpush.msrb.mxu1 %v107_v28  ;;  %v319_v28 = vld [vmem:[#allocation4 + $0x60] sm:$0xff] }
  0x41   :  { %169 = vmatpush.msrb.mxu1 %v105_v30  ;;  %v351_v30 = vld [vmem:[#allocation4 + $0x160] sm:$0xff] }
  0x43   :  { %170 = vmatpush.msrb.mxu1 %v103_v31  ;;  %v352_v31 = vld [vmem:[#allocation4 + $0x168] sm:$0xff] }
  0x45   :  { %171 = vmatpush.msrb.mxu1 %v101_v32  ;;  %v317_v32 = vld [vmem:[#allocation4 + $0x50] sm:$0xff] }
  0x46   :  { %150 = vmatmul.f32.gmra.mxu0 %v83_v34 }
  0x47   :  { %172 = vmatpush.msrb.mxu1 %v99_v33  ;;  %v318_v33 = vld [vmem:[#allocation4 + $0x58] sm:$0xff] }
  0x49   :  { %173 = vmatpush.msrb.mxu1 %v97_v35  ;;  %v350_v35 = vld [vmem:[#allocation4 + $0x158] sm:$0xff] }
  0x4b   :  { %174 = vmatpush.msrb.mxu1 %v95_v36  ;;  %v124_v36 = vld [vmem:[#allocation2] sm:$0x3] }
  0x4d   :  { %175 = vmatpush.msrb.mxu1 %v93_v37  ;;  %v1585_v37 = vperm.slane %v124_v36, 0 }
  0x4e   :  { %176 = vmatmul.f32.vlgmr.msrb.gmra.mxu1 %v80_v17  ;;  %v357_v17 = vld [vmem:[#allocation4 + $0x190] sm:$0xff] }
  0x4f   :  { %477 = vmatpush.msra.mxu1 %v370_v59  ;;  %v308_v59 = vld [vmem:[#allocation4 + $0x8] sm:$0xff] }
  0x51   :  { %478 = vmatpush.msra.mxu1 %v368_v63 }
  0x53   :  { %479 = vmatpush.msra.mxu1 %v366_v3 }
  0x55   :  { %480 = vmatpush.msra.mxu1 %v364_v7 }
  0x56   :  { %179 = vmatmul.f32.gmra.mxu1 %v81_v23  ;;  %v356_v23 = vld [vmem:[#allocation4 + $0x188] sm:$0xff] }
  0x57   :  { %481 = vmatpush.msra.mxu1 %v362_v11 }
  0x59   :  { %482 = vmatpush.msra.mxu1 %v360_v15 }
  0x5b   :  { %483 = vmatpush.msra.mxu1 %v358_v19 }
  0x5d   :  { %484 = vmatpush.msra.mxu1 %v356_v23 }
  0x5e   :  { %182 = vmatmul.f32.gmra.mxu1 %v82_v29  ;;  %v320_v29 = vld [vmem:[#allocation4 + $0x68] sm:$0xff] }
  0x5f   :  { %485 = vmatpush.msra.mxu1 %v354_v27 }
  0x61   :  { %486 = vmatpush.msra.mxu1 %v352_v31 }
  0x63   :  { %487 = vmatpush.msra.mxu1 %v350_v35 }
  0x66   :  { %185 = vmatmul.f32.gmra.mxu1 %v83_v34  ;;  %v349_v34 = vld [vmem:[#allocation4 + $0x150] sm:$0xff] }
  0x6e   :  { %188 = vmatmul.f32.gmra.mxu1 %v84_v18  ;;  %v326_v18 = vld [vmem:[#allocation4 + $0x98] sm:$0xff] }
  0x6f   :  { %448 = vmatpush.msrb.mxu0 %v326_v18 }
  0x71   :  { %449 = vmatpush.msrb.mxu0 %v324_v21 }
  0x73   :  { %450 = vmatpush.msrb.mxu0 %v322_v25 }
  0x75   :  { %451 = vmatpush.msrb.mxu0 %v320_v29 }
  0x76   :  { %191 = vmatmul.f32.gmra.mxu1 %v85_v24  ;;  %v321_v24 = vld [vmem:[#allocation4 + $0x70] sm:$0xff] }
  0x77   :  { %452 = vmatpush.msrb.mxu0 %v318_v33 }
  0xab   :  { %v142_v38 = vpop.f32.mrf.mxu0  ;;  %v154_v39 = vpop.f32.mrf.mxu1 }
  0xb3   :  { %v145_v40 = vpop.f32.mrf.mxu0  ;;  %v157_v41 = vpop.f32.mrf.mxu1 }
  0xb4   :  { %229 = vmatpush.msra.mxu2 %v157_v41  ;;  %v316_v41 = vld [vmem:[#allocation4 + $0x48] sm:$0xff] }
  0xb5   :  { %453 = vmatpush.msrb.mxu0 %v316_v41 }
  0xb6   :  { %230 = vmatpush.msra.mxu2 %v154_v39  ;;  %v315_v39 = vld [vmem:[#allocation4 + $0x40] sm:$0xff] }
  0xbb   :  { %v148_v42 = vpop.f32.mrf.mxu0 }
  0xc3   :  { %v151_v43 = vpop.f32.mrf.mxu0 }
  0xc4   :  { %231 = vmatpush.msra.mxu2 %v151_v43  ;;  %v348_v43 = vld [vmem:[#allocation4 + $0x148] sm:$0xff] }
  0xc5   :  { %488 = vmatpush.msra.mxu1 %v348_v43 }
  0xc6   :  { %232 = vmatpush.msra.mxu2 %v148_v42 }
  0xc8   :  { %233 = vmatpush.msra.mxu2 %v145_v40  ;;  %v347_v40 = vld [vmem:[#allocation4 + $0x140] sm:$0xff] }
  0xca   :  { %234 = vmatpush.msra.mxu2 %v142_v38 }
  0xcb   :  { %v177_v44 = vpop.f32.mrf.mxu1  ;;  %1131 = vmatmul.msk.f32.vlgmr.msra.gmra.mxu2 %vm200_vm0, %v86_v47 }
  0xcc   :  { %372 = vmatpush.msrb.mxu2 %v337_v56 }
  0xce   :  { %373 = vmatpush.msrb.mxu2 %v335_v60 }
  0xd0   :  { %374 = vmatpush.msrb.mxu2 %v333_v0 }
  0xd2   :  { %375 = vmatpush.msrb.mxu2 %v331_v4 }
  0xd3   :  { %v180_v45 = vpop.f32.mrf.mxu1  ;;  %1132 = vmatmul.msk.f32.gmra.mxu2 %vm200_vm0, %v87_v49 }
  0xd4   :  { %376 = vmatpush.msrb.mxu2 %v329_v8 }
  0xd6   :  { %377 = vmatpush.msrb.mxu2 %v327_v12 }
  0xd8   :  { %378 = vmatpush.msrb.mxu2 %v325_v16 }
  0xda   :  { %379 = vmatpush.msrb.mxu2 %v323_v20 }
  0xdb   :  { %v183_v46 = vpop.f32.mrf.mxu1  ;;  %1133 = vmatmul.msk.f32.gmra.mxu2 %vm200_vm0, %v88_v51 }
  0xdc   :  { %380 = vmatpush.msrb.mxu2 %v321_v24 }
  0xde   :  { %381 = vmatpush.msrb.mxu2 %v319_v28 }
  0xe0   :  { %382 = vmatpush.msrb.mxu2 %v317_v32 }
  0xe2   :  { %383 = vmatpush.msrb.mxu2 %v315_v39 }
  0xe3   :  { %v186_v48 = vpop.f32.mrf.mxu1  ;;  %1134 = vmatmul.msk.f32.gmra.mxu2 %vm200_vm0, %v1558_v53 }
  0xeb   :  { %v189_v50 = vpop.f32.mrf.mxu1  ;;  %1135 = vmatmul.msk.f32.gmra.mxu2 %vm200_vm0, %v1565_v54 }
  0xf3   :  { %v192_v52 = vpop.f32.mrf.mxu1  ;;  %1136 = vmatmul.msk.f32.gmra.mxu2 %vm200_vm0, %v1573_v55 }
  0xf4   :  { %264 = vmatpush.msra.mxu3 %v192_v52  ;;  %v309_v52 = vld [vmem:[#allocation4 + $0x10] sm:$0xff] }
  0xf6   :  { %265 = vmatpush.msra.mxu3 %v189_v50  ;;  %v312_v50 = vld [vmem:[#allocation4 + $0x28] sm:$0xff] }
  0xf8   :  { %266 = vmatpush.msra.mxu3 %v186_v48  ;;  %v311_v48 = vld [vmem:[#allocation4 + $0x20] sm:$0xff] }
  0xfa   :  { %267 = vmatpush.msra.mxu3 %v183_v46  ;;  %v314_v46 = vld [vmem:[#allocation4 + $0x38] sm:$0xff] }
  0xfb   :  { %454 = vmatpush.msrb.mxu0 %v314_v46 }
  0xfc   :  { %268 = vmatpush.msra.mxu3 %v180_v45  ;;  %v345_v45 = vld [vmem:[#allocation4 + $0x130] sm:$0xff] }
  0xfd   :  { %455 = vmatpush.msrb.mxu0 %v312_v50 }
  0xfe   :  { %269 = vmatpush.msra.mxu3 %v177_v44  ;;  %v313_v44 = vld [vmem:[#allocation4 + $0x30] sm:$0xff] }
  0xff   :  { %1137 = vmatmul.msk.f32.vlgmr.msra.gmra.mxu3 %vm200_vm0, %v86_v47  ;;  %384 = vmatpush.msrb.mxu2 %v313_v44  ;;  %v346_v47 = vld [vmem:[#allocation4 + $0x138] sm:$0xff] }
 0x100   :  { %407 = vmatpush.msrb.mxu3 %v369_v57  ;;  %489 = vmatpush.msra.mxu1 %v346_v47  ;;  %v307_v57 = vld [vmem:[#allocation4] sm:$0xff] }
 0x101   :  { %385 = vmatpush.msrb.mxu2 %v311_v48 }
 0x102   :  { %408 = vmatpush.msrb.mxu3 %v367_v61 }
 0x103   :  { %386 = vmatpush.msrb.mxu2 %v309_v52 }
 0x104   :  { %409 = vmatpush.msrb.mxu3 %v365_v1 }
 0x105   :  { %387 = vmatpush.msrb.mxu2 %v307_v57 }
 0x106   :  { %410 = vmatpush.msrb.mxu3 %v363_v5  ;;  %v197_v5 = vperm.slane %v124_v36, 1 }
 0x107   :  { %1138 = vmatmul.msk.f32.gmra.mxu3 %vm200_vm0, %v87_v49  ;;  %v343_v49 = vld [vmem:[#allocation4 + $0x120] sm:$0xff] }
 0x108   :  { %411 = vmatpush.msrb.mxu3 %v361_v9 }
 0x10a   :  { %412 = vmatpush.msrb.mxu3 %v359_v13 }
 0x10c   :  { %413 = vmatpush.msrb.mxu3 %v357_v17 }
 0x10e   :  { %414 = vmatpush.msrb.mxu3 %v355_v22 }
 0x10f   :  { %1139 = vmatmul.msk.f32.gmra.mxu3 %vm200_vm0, %v88_v51  ;;  %v344_v51 = vld [vmem:[#allocation4 + $0x128] sm:$0xff] }
 0x110   :  { %415 = vmatpush.msrb.mxu3 %v353_v26  ;;  %490 = vmatpush.msra.mxu1 %v344_v51 }
 0x112   :  { %416 = vmatpush.msrb.mxu3 %v351_v30 }
 0x114   :  { %417 = vmatpush.msrb.mxu3 %v349_v34 }
 0x116   :  { %418 = vmatpush.msrb.mxu3 %v347_v40 }
 0x117   :  { %1140 = vmatmul.msk.f32.gmra.mxu3 %vm200_vm0, %v1558_v53  ;;  %v341_v53 = vld [vmem:[#allocation4 + $0x110] sm:$0xff] }
 0x118   :  { %419 = vmatpush.msrb.mxu3 %v345_v45 }
 0x11a   :  { %420 = vmatpush.msrb.mxu3 %v343_v49 }
 0x11c   :  { %421 = vmatpush.msrb.mxu3 %v341_v53 }
 0x11e   :  { %422 = vmatpush.msrb.mxu3 %v339_v58 }
 0x11f   :  { %1141 = vmatmul.msk.f32.gmra.mxu3 %vm200_vm0, %v1565_v54  ;;  %v310_v54 = vld [vmem:[#allocation4 + $0x18] sm:$0xff] }
 0x120   :  { %456 = vmatpush.msrb.mxu0 %v310_v54 }
 0x122   :  { %457 = vmatpush.msrb.mxu0 %v308_v59 }
 0x127   :  { %1142 = vmatmul.msk.f32.gmra.mxu3 %vm200_vm0, %v1573_v55  ;;  %v342_v55 = vld [vmem:[#allocation4 + $0x118] sm:$0xff] }
 0x128   :  { %491 = vmatpush.msra.mxu1 %v342_v55 }
 0x12a   :  { %492 = vmatpush.msra.mxu1 %v340_v62 }
 0x14e   :  { %v236_v38 = vpop.f32.mrf.mxu2 }
 0x14f   :  { %v237_v42 = vadd.f32 %v236_v38, %v1585_v37 }
 0x151   :  { %1204 = vtanh.f32 %v237_v42 }
 0x156   :  { %v239_v56 = vpop.f32.mrf.mxu2 }
 0x157   :  { %v1588_v60 = vpop.eup %1204  ;;  %v240_v61 = vadd.f32 %v239_v56, %v1585_v37 }
 0x158   :  { %388 = vmatmul.f32.vlgmr.msrb.gmra.mxu2 %v1588_v60  ;;  %458 = vmatmul.f32.vlgmr.msrb.gmra.mxu0 %v1588_v60 }
 0x159   :  { %1206 = vtanh.f32 %v240_v61 }
 0x15e   :  { %v242_v63 = vpop.f32.mrf.mxu2 }
 0x15f   :  { %v1593_v0 = vpop.eup %1206  ;;  %v243_v1 = vadd.f32 %v242_v63, %v1585_v37 }
 0x160   :  { %391 = vmatmul.f32.gmra.mxu2 %v1593_v0  ;;  %461 = vmatmul.f32.gmra.mxu0 %v1593_v0 }
 0x161   :  { %1208 = vtanh.f32 %v243_v1 }
 0x166   :  { %v245_v2 = vpop.f32.mrf.mxu2 }
 0x167   :  { %v1598_v3 = vpop.eup %1208  ;;  %v246_v4 = vadd.f32 %v245_v2, %v1585_v37  ;;  %v301_v2 = vld [vmem:[%s1864_s4] sm:$0xff] }
 0x168   :  { %394 = vmatmul.f32.gmra.mxu2 %v1598_v3  ;;  %464 = vmatmul.f32.gmra.mxu0 %v1598_v3 }
 0x169   :  { %1210 = vtanh.f32 %v246_v4 }
 0x16e   :  { %v248_v7 = vpop.f32.mrf.mxu2 }
 0x16f   :  { %v1603_v8 = vpop.eup %1210  ;;  %v249_v10 = vadd.f32 %v248_v7, %v1585_v37  ;;  %v302_v7 = vld [vmem:[%s1864_s4 + $0x8] sm:$0xff] }
 0x170   :  { %397 = vmatmul.f32.gmra.mxu2 %v1603_v8  ;;  %467 = vmatmul.f32.gmra.mxu0 %v1603_v8 }
 0x176   :  { %v251_v12 = vpop.f32.mrf.mxu2 }
 0x177   :  { %v252_v15 = vadd.f32 %v251_v12, %v1585_v37  ;;  %v656_v12 = vld [vmem:[#allocation4 + $0x2f8] sm:$0xff] }
 0x182   :  { %v271_v6 = vpop.f32.mrf.mxu3 }
 0x183   :  { %v272_v9 = vadd.f32 %v271_v6, %v197_v5 }
 0x185   :  { %1212 = vtanh.f32 %v272_v9  ;;  %v303_v9 = vld [vmem:[%s1864_s4 + $0x10] sm:$0xff] }
 0x186   :  { %1214 = vtanh.f32 %v249_v10  ;;  %v655_v10 = vld [vmem:[#allocation4 + $0x2f0] sm:$0xff] }
 0x187   :  { %691 = vmatpush.msra.mxu0 %v655_v10  ;;  %v663_v10 = vld [vmem:[#allocation4 + $0x330] sm:$0xff] }
 0x18a   :  { %v274_v11 = vpop.f32.mrf.mxu3 }
 0x18b   :  { %v1608_v13 = vpop.eup %1212  ;;  %v275_v14 = vadd.f32 %v274_v11, %v197_v5  ;;  %v687_v11 = vld [vmem:[#allocation4 + $0x3f0] sm:$0xff] }
 0x18c   :  { %v1611_v16 = vpop.eup %1214  ;;  %423 = vmatmul.f32.vlgmr.msrb.gmra.mxu3 %v1608_v13  ;;  %493 = vmatmul.f32.vlgmr.msra.gmra.mxu1 %v1608_v13 }
 0x18d   :  { %1216 = vtanh.f32 %v275_v14  ;;  %400 = vmatmul.f32.gmra.mxu2 %v1611_v16  ;;  %470 = vmatmul.f32.gmra.mxu0 %v1611_v16  ;;  %v688_v14 = vld [vmem:[#allocation4 + $0x3f8] sm:$0xff] }
 0x18e   :  { %1218 = vtanh.f32 %v252_v15  ;;  %726 = vmatpush.msrb.mxu1 %v687_v11  ;;  %v653_v15 = vld [vmem:[#allocation4 + $0x2e0] sm:$0xff]  ;;  %v632_v11 = vld [vmem:[#allocation4 + $0x238] sm:$0xff] }
 0x18f   :  { %692 = vmatpush.msra.mxu0 %v653_v15  ;;  %v661_v15 = vld [vmem:[#allocation4 + $0x320] sm:$0xff] }
 0x192   :  { %v277_v17 = vpop.f32.mrf.mxu3 }
 0x193   :  { %v1617_v18 = vpop.eup %1216  ;;  %v278_v19 = vadd.f32 %v277_v17, %v197_v5  ;;  %v685_v17 = vld [vmem:[#allocation4 + $0x3e0] sm:$0xff] }
 0x194   :  { %v1619_v20 = vpop.eup %1218  ;;  %426 = vmatmul.f32.gmra.mxu3 %v1617_v18  ;;  %496 = vmatmul.f32.gmra.mxu1 %v1617_v18 }
 0x195   :  { %1220 = vtanh.f32 %v278_v19  ;;  %403 = vmatmul.f32.gmra.mxu2 %v1619_v20  ;;  %473 = vmatmul.f32.gmra.mxu0 %v1619_v20  ;;  %v654_v19 = vld [vmem:[#allocation4 + $0x2e8] sm:$0xff] }
 0x196   :  { %727 = vmatpush.msrb.mxu1 %v685_v17  ;;  %v630_v17 = vld [vmem:[#allocation4 + $0x228] sm:$0xff] }
 0x19a   :  { %v280_v21 = vpop.f32.mrf.mxu3 }
 0x19b   :  { %v1625_v22 = vpop.eup %1220  ;;  %v281_v23 = vadd.f32 %v280_v21, %v197_v5  ;;  %v686_v21 = vld [vmem:[#allocation4 + $0x3e8] sm:$0xff] }
 0x19c   :  { %429 = vmatmul.f32.gmra.mxu3 %v1625_v22  ;;  %499 = vmatmul.f32.gmra.mxu1 %v1625_v22 }
 0x19d   :  { %1222 = vtanh.f32 %v281_v23  ;;  %v651_v23 = vld [vmem:[#allocation4 + $0x2d0] sm:$0xff] }
 0x19e   :  { %693 = vmatpush.msra.mxu0 %v651_v23  ;;  %v659_v23 = vld [vmem:[#allocation4 + $0x310] sm:$0xff] }
 0x1a2   :  { %v283_v24 = vpop.f32.mrf.mxu3 }
 0x1a3   :  { %v1629_v25 = vpop.eup %1222  ;;  %v284_v26 = vadd.f32 %v283_v24, %v197_v5  ;;  %v683_v24 = vld [vmem:[#allocation4 + $0x3d0] sm:$0xff] }
 0x1a4   :  { %432 = vmatmul.f32.gmra.mxu3 %v1629_v25  ;;  %502 = vmatmul.f32.gmra.mxu1 %v1629_v25 }
 0x1a5   :  { %1224 = vtanh.f32 %v284_v26  ;;  %v652_v26 = vld [vmem:[#allocation4 + $0x2d8] sm:$0xff]  ;;  %728 = vmatpush.msrb.mxu1 %v683_v24 }
 0x1a6   :  { %v628_v24 = vld [vmem:[#allocation4 + $0x218] sm:$0xff] }
 0x1aa   :  { %v286_v27 = vpop.f32.mrf.mxu3 }
 0x1ab   :  { %v1633_v28 = vpop.eup %1224  ;;  %v287_v29 = vadd.f32 %v286_v27, %v197_v5  ;;  %v684_v27 = vld [vmem:[#allocation4 + $0x3d8] sm:$0xff] }
 0x1ac   :  { %435 = vmatmul.f32.gmra.mxu3 %v1633_v28  ;;  %505 = vmatmul.f32.gmra.mxu1 %v1633_v28 }
 0x1ad   :  { %1226 = vtanh.f32 %v287_v29  ;;  %v649_v29 = vld [vmem:[#allocation4 + $0x2c0] sm:$0xff] }
 0x1ae   :  { %694 = vmatpush.msra.mxu0 %v649_v29  ;;  %v657_v29 = vld [vmem:[#allocation4 + $0x300] sm:$0xff] }
 0x1b3   :  { %v1637_v30 = vpop.eup %1226 }
 0x1b4   :  { %438 = vmatmul.f32.gmra.mxu3 %v1637_v30  ;;  %508 = vmatmul.f32.gmra.mxu1 %v1637_v30 }
 0x1d5   :  { %v459_v31 = vpop.f32.mrf.mxu0 }
 0x1db   :  { %v389_v32 = vpop.f32.mrf.mxu2 }
 0x1dd   :  { %v462_v33 = vpop.f32.mrf.mxu0 }
 0x1e3   :  { %v392_v35 = vpop.f32.mrf.mxu2 }
 0x1e5   :  { %v465_v38 = vpop.f32.mrf.mxu0 }
 0x1eb   :  { %v395_v40 = vpop.f32.mrf.mxu2 }
 0x1ed   :  { %v468_v42 = vpop.f32.mrf.mxu0 }
 0x1f3   :  { %v398_v45 = vpop.f32.mrf.mxu2 }
 0x209   :  { %v494_v34 = vpop.f32.mrf.mxu1 }
 0x20a   :  { %v471_v46 = vpop.f32.mrf.mxu0  ;;  %v495_v63 = vadd.f32 %v494_v34, %v459_v31  ;;  %v681_v31 = vld [vmem:[#allocation4 + $0x3c0] sm:$0xff]  ;;  %v304_v34 = vld [vmem:[%s1864_s4 + $0x18] sm:$0xff] }
 0x20b   :  { %729 = vmatpush.msrb.mxu1 %v681_v31  ;;  %v626_v31 = vld [vmem:[#allocation4 + $0x208] sm:$0xff] }
 0x20f   :  { %v424_v36 = vpop.f32.mrf.mxu3 }
 0x210   :  { %v401_v49 = vpop.f32.mrf.mxu2  ;;  %v425_v6 = vadd.f32 %v424_v36, %v389_v32  ;;  %v650_v32 = vld [vmem:[#allocation4 + $0x2c8] sm:$0xff]  ;;  %v679_v36 = vld [vmem:[#allocation4 + $0x3b0] sm:$0xff] }
 0x211   :  { %v497_v37 = vpop.f32.mrf.mxu1  ;;  %730 = vmatpush.msrb.mxu1 %v679_v36 }
 0x212   :  { %v474_v51 = vpop.f32.mrf.mxu0  ;;  %v498_v61 = vadd.f32 %v497_v37, %v462_v33  ;;  %v682_v33 = vld [vmem:[#allocation4 + $0x3c8] sm:$0xff]  ;;  %v648_v37 = vld [vmem:[#allocation4 + $0x2b8] sm:$0xff] }
 0x217   :  { %v427_v39 = vpop.f32.mrf.mxu3 }
 0x218   :  { %v404_v55 = vpop.f32.mrf.mxu2  ;;  %v428_v5 = vadd.f32 %v427_v39, %v392_v35  ;;  %v647_v35 = vld [vmem:[#allocation4 + $0x2b0] sm:$0xff]  ;;  %v645_v39 = vld [vmem:[#allocation4 + $0x2a0] sm:$0xff] }
 0x219   :  { %v500_v41 = vpop.f32.mrf.mxu1  ;;  %695 = vmatpush.msra.mxu0 %v647_v35 }
 0x21a   :  { %v501_v58 = vadd.f32 %v500_v41, %v465_v38  ;;  %v680_v38 = vld [vmem:[#allocation4 + $0x3b8] sm:$0xff]  ;;  %v646_v41 = vld [vmem:[#allocation4 + $0x2a8] sm:$0xff] }
 0x21b   :  { %696 = vmatpush.msra.mxu0 %v645_v39 }
 0x21f   :  { %v430_v43 = vpop.f32.mrf.mxu3 }
 0x220   :  { %v431_v4 = vadd.f32 %v430_v43, %v395_v40  ;;  %v677_v40 = vld [vmem:[#allocation4 + $0x3a0] sm:$0xff]  ;;  %v643_v43 = vld [vmem:[#allocation4 + $0x290] sm:$0xff] }
 0x221   :  { %v503_v44 = vpop.f32.mrf.mxu1  ;;  %731 = vmatpush.msrb.mxu1 %v677_v40  ;;  %697 = vmatpush.msra.mxu0 %v643_v43 }
 0x222   :  { %v504_v56 = vadd.f32 %v503_v44, %v468_v42  ;;  %v678_v42 = vld [vmem:[#allocation4 + $0x3a8] sm:$0xff]  ;;  %v675_v44 = vld [vmem:[#allocation4 + $0x390] sm:$0xff] }
 0x223   :  { %732 = vmatpush.msrb.mxu1 %v675_v44 }
 0x227   :  { %v433_v47 = vpop.f32.mrf.mxu3 }
 0x228   :  { %v434_v1 = vadd.f32 %v433_v47, %v398_v45  ;;  %v644_v45 = vld [vmem:[#allocation4 + $0x298] sm:$0xff]  ;;  %v641_v47 = vld [vmem:[#allocation4 + $0x280] sm:$0xff] }
 0x229   :  { %v506_v48 = vpop.f32.mrf.mxu1  ;;  %698 = vmatpush.msra.mxu0 %v641_v47 }
 0x22a   :  { %v507_v54 = vadd.f32 %v506_v48, %v471_v46  ;;  %v676_v46 = vld [vmem:[#allocation4 + $0x398] sm:$0xff]  ;;  %v673_v48 = vld [vmem:[#allocation4 + $0x380] sm:$0xff] }
 0x22b   :  { %733 = vmatpush.msrb.mxu1 %v673_v48 }
 0x22f   :  { %v436_v50 = vpop.f32.mrf.mxu3 }
 0x230   :  { %v437_v62 = vadd.f32 %v436_v50, %v401_v49  ;;  %v305_v49 = vld [vmem:[%s1864_s4 + $0x20] sm:$0xff]  ;;  %v642_v50 = vld [vmem:[#allocation4 + $0x288] sm:$0xff] }
 0x231   :  { %v509_v52 = vpop.f32.mrf.mxu1 }
 0x232   :  { %v510_v53 = vadd.f32 %v509_v52, %v474_v51  ;;  %v674_v51 = vld [vmem:[#allocation4 + $0x388] sm:$0xff]  ;;  %v639_v52 = vld [vmem:[#allocation4 + $0x270] sm:$0xff] }
 0x233   :  { %699 = vmatpush.msra.mxu0 %v639_v52 }
 0x234   :  { %580 = vmatpush.msra.mxu3 %v510_v53  ;;  %v671_v53 = vld [vmem:[#allocation4 + $0x370] sm:$0xff] }
 0x235   :  { %734 = vmatpush.msrb.mxu1 %v671_v53 }
 0x236   :  { %581 = vmatpush.msra.mxu3 %v507_v54  ;;  %v640_v54 = vld [vmem:[#allocation4 + $0x278] sm:$0xff] }
 0x237   :  { %v439_v57 = vpop.f32.mrf.mxu3 }
 0x238   :  { %v440_v59 = vadd.f32 %v439_v57, %v404_v55  ;;  %582 = vmatpush.msra.mxu3 %v504_v56  ;;  %v672_v55 = vld [vmem:[#allocation4 + $0x378] sm:$0xff]  ;;  %v637_v56 = vld [vmem:[#allocation4 + $0x260] sm:$0xff] }
 0x239   :  { %v669_v57 = vld [vmem:[#allocation4 + $0x360] sm:$0xff]  ;;  %700 = vmatpush.msra.mxu0 %v637_v56 }
 0x23a   :  { %545 = vmatpush.msra.mxu2 %v440_v59  ;;  %583 = vmatpush.msra.mxu3 %v501_v58  ;;  %v638_v58 = vld [vmem:[#allocation4 + $0x268] sm:$0xff] }
 0x23b   :  { %v670_v59 = vld [vmem:[#allocation4 + $0x368] sm:$0xff]  ;;  %735 = vmatpush.msrb.mxu1 %v669_v57 }
 0x23c   :  { %546 = vmatpush.msra.mxu2 %v437_v62  ;;  %584 = vmatpush.msra.mxu3 %v498_v61  ;;  %v635_v61 = vld [vmem:[#allocation4 + $0x250] sm:$0xff] }
 0x23d   :  { %v667_v62 = vld [vmem:[#allocation4 + $0x350] sm:$0xff]  ;;  %701 = vmatpush.msra.mxu0 %v635_v61 }
 0x23e   :  { %547 = vmatpush.msra.mxu2 %v434_v1  ;;  %585 = vmatpush.msra.mxu3 %v495_v63  ;;  %v636_v63 = vld [vmem:[#allocation4 + $0x258] sm:$0xff] }
 0x23f   :  { %1149 = vmatmul.msk.f32.vlgmr.msra.gmra.mxu3 %vm200_vm0, %v301_v2  ;;  %v668_v1 = vld [vmem:[#allocation4 + $0x358] sm:$0xff]  ;;  %736 = vmatpush.msrb.mxu1 %v667_v62 }
 0x240   :  { %548 = vmatpush.msra.mxu2 %v431_v4  ;;  %796 = vmatpush.msrb.mxu3 %v688_v14  ;;  %v633_v4 = vld [vmem:[#allocation4 + $0x240] sm:$0xff] }
 0x241   :  { %702 = vmatpush.msra.mxu0 %v633_v4  ;;  %v629_v14 = vld [vmem:[#allocation4 + $0x220] sm:$0xff] }
 0x242   :  { %549 = vmatpush.msra.mxu2 %v428_v5  ;;  %797 = vmatpush.msrb.mxu3 %v686_v21  ;;  %v665_v5 = vld [vmem:[#allocation4 + $0x340] sm:$0xff]  ;;  %v627_v21 = vld [vmem:[#allocation4 + $0x210] sm:$0xff] }
 0x243   :  { %737 = vmatpush.msrb.mxu1 %v665_v5 }
 0x244   :  { %550 = vmatpush.msra.mxu2 %v425_v6  ;;  %798 = vmatpush.msrb.mxu3 %v684_v27  ;;  %v634_v6 = vld [vmem:[#allocation4 + $0x248] sm:$0xff]  ;;  %v625_v27 = vld [vmem:[#allocation4 + $0x200] sm:$0xff] }
 0x245   :  { %1143 = vmatmul.msk.f32.vlgmr.msra.gmra.mxu2 %vm200_vm0, %v301_v2  ;;  %v306_v2 = vld [vmem:[%s1864_s4 + $0x28] sm:$0xff]  ;;  %738 = vmatpush.msrb.mxu1 %v663_v10 }
 0x246   :  { %761 = vmatpush.msrb.mxu2 %v656_v12  ;;  %799 = vmatpush.msrb.mxu3 %v682_v33  ;;  %v664_v12 = vld [vmem:[#allocation4 + $0x338] sm:$0xff] }
 0x247   :  { %1150 = vmatmul.msk.f32.gmra.mxu3 %vm200_vm0, %v302_v7  ;;  %739 = vmatpush.msrb.mxu1 %v661_v15  ;;  %v371_v33 = vld [vmem:[%s1866_s6] sm:$0x3] }
 0x248   :  { %762 = vmatpush.msrb.mxu2 %v654_v19  ;;  %800 = vmatpush.msrb.mxu3 %v680_v38  ;;  %v662_v19 = vld [vmem:[#allocation4 + $0x328] sm:$0xff] }
 0x249   :  { %740 = vmatpush.msrb.mxu1 %v659_v23 }
 0x24a   :  { %763 = vmatpush.msrb.mxu2 %v652_v26  ;;  %801 = vmatpush.msrb.mxu3 %v678_v42  ;;  %v660_v26 = vld [vmem:[#allocation4 + $0x318] sm:$0xff] }
 0x24b   :  { %741 = vmatpush.msrb.mxu1 %v657_v29 }
 0x24c   :  { %764 = vmatpush.msrb.mxu2 %v650_v32  ;;  %802 = vmatpush.msrb.mxu3 %v676_v46  ;;  %v658_v32 = vld [vmem:[#allocation4 + $0x308] sm:$0xff] }
 0x24d   :  { %1144 = vmatmul.msk.f32.gmra.mxu2 %vm200_vm0, %v302_v7  ;;  %v666_v7 = vld [vmem:[#allocation4 + $0x348] sm:$0xff] }
 0x24e   :  { %765 = vmatpush.msrb.mxu2 %v648_v37  ;;  %803 = vmatpush.msrb.mxu3 %v674_v51  ;;  %v513_v37 = vperm.slane %v371_v33, 0 }
 0x24f   :  { %1151 = vmatmul.msk.f32.gmra.mxu3 %vm200_vm0, %v303_v9 }
 0x250   :  { %766 = vmatpush.msrb.mxu2 %v646_v41  ;;  %804 = vmatpush.msrb.mxu3 %v672_v55 }
 0x252   :  { %767 = vmatpush.msrb.mxu2 %v644_v45  ;;  %805 = vmatpush.msrb.mxu3 %v670_v59 }
 0x254   :  { %768 = vmatpush.msrb.mxu2 %v642_v50  ;;  %806 = vmatpush.msrb.mxu3 %v668_v1 }
 0x255   :  { %1145 = vmatmul.msk.f32.gmra.mxu2 %vm200_vm0, %v303_v9  ;;  %v631_v9 = vld [vmem:[#allocation4 + $0x230] sm:$0xff] }
 0x256   :  { %769 = vmatpush.msrb.mxu2 %v640_v54  ;;  %807 = vmatpush.msrb.mxu3 %v666_v7 }
 0x257   :  { %1152 = vmatmul.msk.f32.gmra.mxu3 %vm200_vm0, %v304_v34  ;;  %703 = vmatpush.msra.mxu0 %v631_v9 }
 0x258   :  { %770 = vmatpush.msrb.mxu2 %v638_v58  ;;  %808 = vmatpush.msrb.mxu3 %v664_v12 }
 0x259   :  { %704 = vmatpush.msra.mxu0 %v629_v14 }
 0x25a   :  { %771 = vmatpush.msrb.mxu2 %v636_v63  ;;  %809 = vmatpush.msrb.mxu3 %v662_v19 }
 0x25b   :  { %705 = vmatpush.msra.mxu0 %v627_v21 }
 0x25c   :  { %772 = vmatpush.msrb.mxu2 %v634_v6  ;;  %810 = vmatpush.msrb.mxu3 %v660_v26 }
 0x25d   :  { %1146 = vmatmul.msk.f32.gmra.mxu2 %vm200_vm0, %v304_v34  ;;  %706 = vmatpush.msra.mxu0 %v625_v27  ;;  %v514_v34 = vperm.slane %v371_v33, 1 }
 0x25e   :  { %773 = vmatpush.msrb.mxu2 %v632_v11  ;;  %811 = vmatpush.msrb.mxu3 %v658_v32 }
 0x25f   :  { %1153 = vmatmul.msk.f32.gmra.mxu3 %vm200_vm0, %v305_v49 }
 0x260   :  { %774 = vmatpush.msrb.mxu2 %v630_v17 }
 0x262   :  { %775 = vmatpush.msrb.mxu2 %v628_v24 }
 0x264   :  { %776 = vmatpush.msrb.mxu2 %v626_v31 }
 0x265   :  { %1147 = vmatmul.msk.f32.gmra.mxu2 %vm200_vm0, %v305_v49 }
 0x267   :  { %1154 = vmatmul.msk.f32.gmra.mxu3 %vm200_vm0, %v306_v2 }
 0x26d   :  { %1148 = vmatmul.msk.f32.gmra.mxu2 %vm200_vm0, %v306_v2 }
 0x2c2   :  { %v587_v35 = vpop.f32.mrf.mxu3 }
 0x2c3   :  { %v588_v36 = vadd.f32 %v587_v35, %v514_v34 }
 0x2c5   :  { %1228 = vtanh.f32 %v588_v36 }
 0x2c8   :  { %v552_v38 = vpop.f32.mrf.mxu2 }
 0x2c9   :  { %v553_v39 = vadd.f32 %v552_v38, %v513_v37 }
 0x2ca   :  { %v590_v40 = vpop.f32.mrf.mxu3 }
 0x2cb   :  { %v1229_v41 = vpop.eup %1228  ;;  %1230 = vtanh.f32 %v553_v39  ;;  %v591_v42 = vadd.f32 %v590_v40, %v514_v34 }
 0x2cc   :  { %742 = vmatmul.f32.vlgmr.msrb.gmra.mxu1 %v1229_v41  ;;  %812 = vmatmul.f32.vlgmr.msrb.gmra.mxu3 %v1229_v41 }
 0x2cd   :  { %1232 = vtanh.f32 %v591_v42 }
 0x2d0   :  { %v555_v43 = vpop.f32.mrf.mxu2 }
 0x2d1   :  { %v1231_v44 = vpop.eup %1230  ;;  %v556_v45 = vadd.f32 %v555_v43, %v513_v37 }
 0x2d2   :  { %707 = vmatmul.f32.vlgmr.msra.gmra.mxu0 %v1231_v44  ;;  %777 = vmatmul.f32.vlgmr.msrb.gmra.mxu2 %v1231_v44  ;;  %v593_v46 = vpop.f32.mrf.mxu3 }
 0x2d3   :  { %v1233_v47 = vpop.eup %1232  ;;  %1234 = vtanh.f32 %v556_v45  ;;  %v594_v48 = vadd.f32 %v593_v46, %v514_v34 }
 0x2d4   :  { %745 = vmatmul.f32.gmra.mxu1 %v1233_v47  ;;  %815 = vmatmul.f32.gmra.mxu3 %v1233_v47 }
 0x2d5   :  { %1236 = vtanh.f32 %v594_v48 }
 0x2d8   :  { %v558_v49 = vpop.f32.mrf.mxu2 }
 0x2d9   :  { %v1235_v50 = vpop.eup %1234  ;;  %v559_v51 = vadd.f32 %v558_v49, %v513_v37 }
 0x2da   :  { %710 = vmatmul.f32.gmra.mxu0 %v1235_v50  ;;  %780 = vmatmul.f32.gmra.mxu2 %v1235_v50  ;;  %v596_v52 = vpop.f32.mrf.mxu3 }
 0x2db   :  { %v1237_v53 = vpop.eup %1236  ;;  %1238 = vtanh.f32 %v559_v51  ;;  %v597_v54 = vadd.f32 %v596_v52, %v514_v34 }
 0x2dc   :  { %748 = vmatmul.f32.gmra.mxu1 %v1237_v53  ;;  %818 = vmatmul.f32.gmra.mxu3 %v1237_v53  ;;  %v1155_v53 = vld [vmem:[%s1864_s4 + $0x30] sm:$0xff] }
 0x2dd   :  { %1240 = vtanh.f32 %v597_v54 }
 0x2e0   :  { %v561_v55 = vpop.f32.mrf.mxu2 }
 0x2e1   :  { %v1239_v56 = vpop.eup %1238  ;;  %v562_v57 = vadd.f32 %v561_v55, %v513_v37 }
 0x2e2   :  { %713 = vmatmul.f32.gmra.mxu0 %v1239_v56  ;;  %783 = vmatmul.f32.gmra.mxu2 %v1239_v56  ;;  %v599_v58 = vpop.f32.mrf.mxu3 }
 0x2e3   :  { %v1241_v59 = vpop.eup %1240  ;;  %1242 = vtanh.f32 %v562_v57  ;;  %v600_v61 = vadd.f32 %v599_v58, %v514_v34  ;;  %v1156_v57 = vld [vmem:[%s1864_s4 + $0x38] sm:$0xff]  ;;  %v1157_v58 = vld [vmem:[%s1864_s4 + $0x40] sm:$0xff] }
 0x2e4   :  { %751 = vmatmul.f32.gmra.mxu1 %v1241_v59  ;;  %821 = vmatmul.f32.gmra.mxu3 %v1241_v59  ;;  %v969_v59 = vld [vmem:[%s1868_s8 + $0x78] sm:$0xff] }
 0x2e5   :  { %1244 = vtanh.f32 %v600_v61  ;;  %v968_v61 = vld [vmem:[%s1868_s8 + $0x70] sm:$0xff]  ;;  %987 = vmatpush.msra.mxu2 %v969_v59 }
 0x2e7   :  { %988 = vmatpush.msra.mxu2 %v968_v61 }
 0x2e8   :  { %v564_v62 = vpop.f32.mrf.mxu2 }
 0x2e9   :  { %v1243_v63 = vpop.eup %1242  ;;  %v565_v1 = vadd.f32 %v564_v62, %v513_v37  ;;  %v985_v62 = vld [vmem:[%s1868_s8 + $0xf8] sm:$0xff] }
 0x2ea   :  { %716 = vmatmul.f32.gmra.mxu0 %v1243_v63  ;;  %786 = vmatmul.f32.gmra.mxu2 %v1243_v63  ;;  %v602_v2 = vpop.f32.mrf.mxu3  ;;  %v967_v63 = vld [vmem:[%s1868_s8 + $0x68] sm:$0xff] }
 0x2eb   :  { %v1245_v4 = vpop.eup %1244  ;;  %1246 = vtanh.f32 %v565_v1  ;;  %v603_v5 = vadd.f32 %v602_v2, %v514_v34  ;;  %1022 = vmatpush.msra.mxu3 %v985_v62  ;;  %v984_v1 = vld [vmem:[%s1868_s8 + $0xf0] sm:$0xff]  ;;  %v983_v2 = vld [vmem:[%s1868_s8 + $0xe8] sm:$0xff]  ;;  %989 = vmatpush.msra.mxu2 %v967_v63 }
 0x2ec   :  { %754 = vmatmul.f32.gmra.mxu1 %v1245_v4  ;;  %824 = vmatmul.f32.gmra.mxu3 %v1245_v4  ;;  %v966_v4 = vld [vmem:[%s1868_s8 + $0x60] sm:$0xff] }
 0x2ed   :  { %1248 = vtanh.f32 %v603_v5  ;;  %1023 = vmatpush.msra.mxu3 %v984_v1  ;;  %v982_v5 = vld [vmem:[%s1868_s8 + $0xe0] sm:$0xff]  ;;  %990 = vmatpush.msra.mxu2 %v966_v4 }
 0x2ef   :  { %1024 = vmatpush.msra.mxu3 %v983_v2 }
 0x2f0   :  { %v567_v6 = vpop.f32.mrf.mxu2 }
 0x2f1   :  { %v1247_v7 = vpop.eup %1246  ;;  %v568_v9 = vadd.f32 %v567_v6, %v513_v37  ;;  %v965_v6 = vld [vmem:[%s1868_s8 + $0x58] sm:$0xff]  ;;  %1025 = vmatpush.msra.mxu3 %v982_v5 }
 0x2f2   :  { %719 = vmatmul.f32.gmra.mxu0 %v1247_v7  ;;  %789 = vmatmul.f32.gmra.mxu2 %v1247_v7  ;;  %v1158_v7 = vld [vmem:[%s1864_s4 + $0x48] sm:$0xff] }
 0x2f3   :  { %v1249_v10 = vpop.eup %1248  ;;  %1250 = vtanh.f32 %v568_v9  ;;  %v981_v9 = vld [vmem:[%s1868_s8 + $0xd8] sm:$0xff]  ;;  %991 = vmatpush.msra.mxu2 %v965_v6 }
 0x2f4   :  { %757 = vmatmul.f32.gmra.mxu1 %v1249_v10  ;;  %827 = vmatmul.f32.gmra.mxu3 %v1249_v10  ;;  %v964_v10 = vld [vmem:[%s1868_s8 + $0x50] sm:$0xff] }
 0x2f5   :  { %1026 = vmatpush.msra.mxu3 %v981_v9  ;;  %992 = vmatpush.msra.mxu2 %v964_v10 }
 0x2f9   :  { %v1251_v11 = vpop.eup %1250 }
 0x2fa   :  { %722 = vmatmul.f32.gmra.mxu0 %v1251_v11  ;;  %792 = vmatmul.f32.gmra.mxu2 %v1251_v11  ;;  %v980_v11 = vld [vmem:[%s1868_s8 + $0xd0] sm:$0xff] }
 0x2fb   :  { %1027 = vmatpush.msra.mxu3 %v980_v11 }
 0x349   :  { %v743_v12 = vpop.f32.mrf.mxu1 }
 0x34f   :  { %v708_v14 = vpop.f32.mrf.mxu0  ;;  %v813_v15 = vpop.f32.mrf.mxu3 }
 0x350   :  { %v744_v51 = vadd.f32 %v743_v12, %v708_v14  ;;  %v963_v12 = vld [vmem:[%s1868_s8 + $0x48] sm:$0xff] }
 0x351   :  { %v746_v17 = vpop.f32.mrf.mxu1  ;;  %v979_v14 = vld [vmem:[%s1868_s8 + $0xc8] sm:$0xff]  ;;  %993 = vmatpush.msra.mxu2 %v963_v12 }
 0x352   :  { %1028 = vmatpush.msra.mxu3 %v979_v14 }
 0x355   :  { %v778_v19 = vpop.f32.mrf.mxu2 }
 0x356   :  { %v814_v56 = vadd.f32 %v813_v15, %v778_v19  ;;  %v962_v15 = vld [vmem:[%s1868_s8 + $0x40] sm:$0xff]  ;;  %v1159_v19 = vld [vmem:[%s1864_s4 + $0x50] sm:$0xff] }
 0x357   :  { %v711_v21 = vpop.f32.mrf.mxu0  ;;  %v816_v23 = vpop.f32.mrf.mxu3  ;;  %994 = vmatpush.msra.mxu2 %v962_v15 }
 0x358   :  { %v747_v49 = vadd.f32 %v746_v17, %v711_v21  ;;  %v961_v17 = vld [vmem:[%s1868_s8 + $0x38] sm:$0xff]  ;;  %v960_v21 = vld [vmem:[%s1868_s8 + $0x30] sm:$0xff] }
 0x359   :  { %v749_v24 = vpop.f32.mrf.mxu1  ;;  %995 = vmatpush.msra.mxu2 %v961_v17 }
 0x35b   :  { %996 = vmatpush.msra.mxu2 %v960_v21 }
 0x35d   :  { %v781_v26 = vpop.f32.mrf.mxu2 }
 0x35e   :  { %v817_v55 = vadd.f32 %v816_v23, %v781_v26  ;;  %v1160_v23 = vld [vmem:[%s1864_s4 + $0x58] sm:$0xff]  ;;  %v978_v26 = vld [vmem:[%s1868_s8 + $0xc0] sm:$0xff] }
 0x35f   :  { %v714_v27 = vpop.f32.mrf.mxu0  ;;  %v819_v29 = vpop.f32.mrf.mxu3  ;;  %1029 = vmatpush.msra.mxu3 %v978_v26 }
 0x360   :  { %v750_v47 = vadd.f32 %v749_v24, %v714_v27  ;;  %v959_v24 = vld [vmem:[%s1868_s8 + $0x28] sm:$0xff]  ;;  %v958_v27 = vld [vmem:[%s1868_s8 + $0x20] sm:$0xff] }
 0x361   :  { %v752_v31 = vpop.f32.mrf.mxu1  ;;  %997 = vmatpush.msra.mxu2 %v959_v24 }
 0x363   :  { %998 = vmatpush.msra.mxu2 %v958_v27 }
 0x365   :  { %v784_v32 = vpop.f32.mrf.mxu2 }
 0x366   :  { %v820_v54 = vadd.f32 %v819_v29, %v784_v32  ;;  %v977_v29 = vld [vmem:[%s1868_s8 + $0xb8] sm:$0xff]  ;;  %v976_v32 = vld [vmem:[%s1868_s8 + $0xb0] sm:$0xff] }
 0x367   :  { %v717_v33 = vpop.f32.mrf.mxu0  ;;  %v822_v34 = vpop.f32.mrf.mxu3  ;;  %1030 = vmatpush.msra.mxu3 %v977_v29 }
 0x368   :  { %v753_v45 = vadd.f32 %v752_v31, %v717_v33  ;;  %v957_v31 = vld [vmem:[%s1868_s8 + $0x18] sm:$0xff]  ;;  %v956_v33 = vld [vmem:[%s1868_s8 + $0x10] sm:$0xff] }
 0x369   :  { %v755_v35 = vpop.f32.mrf.mxu1  ;;  %999 = vmatpush.msra.mxu2 %v957_v31  ;;  %1031 = vmatpush.msra.mxu3 %v976_v32 }
 0x36b   :  { %1000 = vmatpush.msra.mxu2 %v956_v33 }
 0x36d   :  { %v787_v36 = vpop.f32.mrf.mxu2 }
 0x36e   :  { %v823_v52 = vadd.f32 %v822_v34, %v787_v36  ;;  %v975_v34 = vld [vmem:[%s1868_s8 + $0xa8] sm:$0xff]  ;;  %v974_v36 = vld [vmem:[%s1868_s8 + $0xa0] sm:$0xff] }
 0x36f   :  { %v720_v37 = vpop.f32.mrf.mxu0  ;;  %v825_v38 = vpop.f32.mrf.mxu3  ;;  %1032 = vmatpush.msra.mxu3 %v975_v34 }
 0x370   :  { %v756_v43 = vadd.f32 %v755_v35, %v720_v37  ;;  %v955_v35 = vld [vmem:[%s1868_s8 + $0x8] sm:$0xff]  ;;  %v954_v37 = vld [vmem:[%s1868_s8] sm:$0xff] }
 0x371   :  { %v758_v40 = vpop.f32.mrf.mxu1  ;;  %1001 = vmatpush.msra.mxu2 %v955_v35  ;;  %1033 = vmatpush.msra.mxu3 %v974_v36 }
 0x373   :  { %1002 = vmatpush.msra.mxu2 %v954_v37 }
 0x375   :  { %v790_v39 = vpop.f32.mrf.mxu2 }
 0x376   :  { %v826_v50 = vadd.f32 %v825_v38, %v790_v39  ;;  %v973_v38 = vld [vmem:[%s1868_s8 + $0x98] sm:$0xff]  ;;  %v972_v39 = vld [vmem:[%s1868_s8 + $0x90] sm:$0xff] }
 0x377   :  { %v723_v41 = vpop.f32.mrf.mxu0  ;;  %v828_v44 = vpop.f32.mrf.mxu3  ;;  %1034 = vmatpush.msra.mxu3 %v973_v38 }
 0x378   :  { %v759_v42 = vadd.f32 %v758_v40, %v723_v41  ;;  %v971_v40 = vld [vmem:[%s1868_s8 + $0x88] sm:$0xff]  ;;  %v970_v41 = vld [vmem:[%s1868_s8 + $0x80] sm:$0xff] }
 0x379   :  { %1035 = vmatpush.msra.mxu3 %v972_v39 }
 0x37a   :  { %864 = vmatpush.msrb.mxu0 %v759_v42  ;;  %v1161_v42 = vld [vmem:[%s1866_s6 + $0x2] sm:$0x3] }
 0x37b   :  { %1036 = vmatpush.msra.mxu3 %v971_v40 }
 0x37c   :  { %865 = vmatpush.msrb.mxu0 %v756_v43  ;;  %v832_v43 = vperm.slane %v1161_v42, 0 }
 0x37d   :  { %v793_v46 = vpop.f32.mrf.mxu2  ;;  %1037 = vmatpush.msra.mxu3 %v970_v41 }
 0x37e   :  { %v829_v48 = vadd.f32 %v828_v44, %v793_v46  ;;  %866 = vmatpush.msrb.mxu0 %v753_v45  ;;  %v833_v46 = vperm.slane %v1161_v42, 1 }
 0x380   :  { %867 = vmatpush.msrb.mxu0 %v750_v47  ;;  %899 = vmatpush.msra.mxu1 %v829_v48 }
 0x382   :  { %868 = vmatpush.msrb.mxu0 %v747_v49  ;;  %900 = vmatpush.msra.mxu1 %v826_v50 }
 0x384   :  { %869 = vmatpush.msrb.mxu0 %v744_v51  ;;  %901 = vmatpush.msra.mxu1 %v823_v52 }
 0x385   :  { %1162 = vmatmul.msk.f32.vlgmr.msrb.gmra.mxu0 %vm200_vm0, %v1155_v53 }
 0x386   :  { %902 = vmatpush.msra.mxu1 %v820_v54 }
 0x388   :  { %903 = vmatpush.msra.mxu1 %v817_v55 }
 0x38a   :  { %904 = vmatpush.msra.mxu1 %v814_v56 }
 0x38b   :  { %1168 = vmatmul.msk.f32.vlgmr.msra.gmra.mxu1 %vm200_vm0, %v1155_v53 }
 0x38d   :  { %1163 = vmatmul.msk.f32.gmra.mxu0 %vm200_vm0, %v1156_v57 }
 0x393   :  { %1169 = vmatmul.msk.f32.gmra.mxu1 %vm200_vm0, %v1156_v57 }
 0x395   :  { %1164 = vmatmul.msk.f32.gmra.mxu0 %vm200_vm0, %v1157_v58 }
 0x39b   :  { %1170 = vmatmul.msk.f32.gmra.mxu1 %vm200_vm0, %v1157_v58 }
 0x39d   :  { %1165 = vmatmul.msk.f32.gmra.mxu0 %vm200_vm0, %v1158_v7 }
 0x3a3   :  { %1171 = vmatmul.msk.f32.gmra.mxu1 %vm200_vm0, %v1158_v7 }
 0x3a5   :  { %1166 = vmatmul.msk.f32.gmra.mxu0 %vm200_vm0, %v1159_v19 }
 0x3ab   :  { %1172 = vmatmul.msk.f32.gmra.mxu1 %vm200_vm0, %v1159_v19 }
 0x3ad   :  { %1167 = vmatmul.msk.f32.gmra.mxu0 %vm200_vm0, %v1160_v23 }
 0x3b3   :  { %1173 = vmatmul.msk.f32.gmra.mxu1 %vm200_vm0, %v1160_v23 }
 0x402   :  { %v871_v44 = vpop.f32.mrf.mxu0 }
 0x403   :  { %v872_v45 = vadd.f32 %v871_v44, %v832_v43 }
 0x405   :  { %1252 = vtanh.f32 %v872_v45 }
 0x408   :  { %v906_v47 = vpop.f32.mrf.mxu1 }
 0x409   :  { %v907_v48 = vadd.f32 %v906_v47, %v833_v46  ;;  %v948_v47 = vld [vmem:[#allocation6] sm:$0xff] }
 0x40a   :  { %v874_v49 = vpop.f32.mrf.mxu0 }
 0x40b   :  { %v1253_v50 = vpop.eup %1252  ;;  %1254 = vtanh.f32 %v907_v48  ;;  %v875_v51 = vadd.f32 %v874_v49, %v832_v43  ;;  %v949_v48 = vld [vmem:[#allocation6 + $0x8] sm:$0xff]  ;;  %v950_v49 = vld [vmem:[#allocation6 + $0x10] sm:$0xff] }
 0x40c   :  { %v936_v52 = vadd.f32 %v1253_v50, %v1588_v60  ;;  %v951_v50 = vld [vmem:[#allocation6 + $0x18] sm:$0xff] }
 0x40d   :  { %1256 = vtanh.f32 %v875_v51  ;;  %v952_v51 = vld [vmem:[#allocation6 + $0x20] sm:$0xff] }
 0x40e   :  { %1003 = vmatmul.f32.vlgmr.msra.gmra.mxu2 %v936_v52  ;;  %v953_v52 = vld [vmem:[#allocation6 + $0x28] sm:$0xff] }
 0x410   :  { %v909_v53 = vpop.f32.mrf.mxu1 }
 0x411   :  { %v1255_v54 = vpop.eup %1254  ;;  %v910_v55 = vadd.f32 %v909_v53, %v833_v46  ;;  %v1203_v53 = vld [vmem:[%s1869_s9] ss:$0 sm:$0xff] }
 0x412   :  { %v937_v56 = vadd.f32 %v1255_v54, %v1608_v13  ;;  %v877_v57 = vpop.f32.mrf.mxu0 }
 0x413   :  { %v1257_v58 = vpop.eup %1256  ;;  %1258 = vtanh.f32 %v910_v55  ;;  %v878_v59 = vadd.f32 %v877_v57, %v832_v43 }
 0x414   :  { %1038 = vmatmul.f32.vlgmr.msra.gmra.mxu3 %v937_v56  ;;  %v938_v61 = vadd.f32 %v1257_v58, %v1593_v0  ;;  %v1276_v56 = vld [vmem:[%s1860_s0] sm:$0xff] }
 0x415   :  { %1260 = vtanh.f32 %v878_v59 }
 0x416   :  { %1006 = vmatmul.f32.gmra.mxu2 %v938_v61  ;;  %v1277_v61 = vld [vmem:[%s1860_s0 + $0x8] sm:$0xff] }
 0x418   :  { %v912_v62 = vpop.f32.mrf.mxu1 }
 0x419   :  { %v1259_v63 = vpop.eup %1258  ;;  %v913_v1 = vadd.f32 %v912_v62, %v833_v46 }
 0x41a   :  { %v880_v60 = vpop.f32.mrf.mxu0  ;;  %v939_v2 = vadd.f32 %v1259_v63, %v1617_v18 }
 0x41b   :  { %v1261_v4 = vpop.eup %1260  ;;  %1262 = vtanh.f32 %v913_v1  ;;  %v881_v5 = vadd.f32 %v880_v60, %v832_v43  ;;  %v1278_v60 = vld [vmem:[%s1860_s0 + $0x10] sm:$0xff] }
 0x41c   :  { %1041 = vmatmul.f32.gmra.mxu3 %v939_v2  ;;  %v940_v13 = vadd.f32 %v1261_v4, %v1598_v3 }
 0x41d   :  { %1264 = vtanh.f32 %v881_v5 }
 0x41e   :  { %1009 = vmatmul.f32.gmra.mxu2 %v940_v13  ;;  %v1279_v13 = vld [vmem:[%s1860_s0 + $0x18] sm:$0xff] }
 0x420   :  { %v915_v6 = vpop.f32.mrf.mxu1 }
 0x421   :  { %v1263_v7 = vpop.eup %1262  ;;  %v916_v9 = vadd.f32 %v915_v6, %v833_v46 }
 0x422   :  { %v883_v0 = vpop.f32.mrf.mxu0  ;;  %v941_v10 = vadd.f32 %v1263_v7, %v1625_v22 }
 0x423   :  { %v1265_v11 = vpop.eup %1264  ;;  %1266 = vtanh.f32 %v916_v9  ;;  %v884_v12 = vadd.f32 %v883_v0, %v832_v43  ;;  %v1280_v0 = vld [vmem:[%s1860_s0 + $0x20] sm:$0xff] }
 0x424   :  { %1044 = vmatmul.f32.gmra.mxu3 %v941_v10  ;;  %v942_v18 = vadd.f32 %v1265_v11, %v1603_v8 }
 0x425   :  { %1268 = vtanh.f32 %v884_v12 }
 0x426   :  { %1012 = vmatmul.f32.gmra.mxu2 %v942_v18  ;;  %v1281_v18 = vld [vmem:[%s1860_s0 + $0x28] sm:$0xff] }
 0x428   :  { %v918_v14 = vpop.f32.mrf.mxu1 }
 0x429   :  { %v1267_v15 = vpop.eup %1266  ;;  %v919_v17 = vadd.f32 %v918_v14, %v833_v46 }
 0x42a   :  { %v886_v3 = vpop.f32.mrf.mxu0  ;;  %v943_v19 = vadd.f32 %v1267_v15, %v1629_v25 }
 0x42b   :  { %v1269_v21 = vpop.eup %1268  ;;  %1270 = vtanh.f32 %v919_v17  ;;  %v887_v23 = vadd.f32 %v886_v3, %v832_v43 }
 0x42c   :  { %1047 = vmatmul.f32.gmra.mxu3 %v943_v19  ;;  %v944_v22 = vadd.f32 %v1269_v21, %v1611_v16 }
 0x42d   :  { %1272 = vtanh.f32 %v887_v23 }
 0x42e   :  { %1015 = vmatmul.f32.gmra.mxu2 %v944_v22 }
 0x430   :  { %v921_v24 = vpop.f32.mrf.mxu1 }
 0x431   :  { %v1271_v26 = vpop.eup %1270  ;;  %v922_v27 = vadd.f32 %v921_v24, %v833_v46 }
 0x432   :  { %v945_v8 = vadd.f32 %v1271_v26, %v1633_v28 }
 0x433   :  { %v1273_v29 = vpop.eup %1272  ;;  %1274 = vtanh.f32 %v922_v27 }
 0x434   :  { %1050 = vmatmul.f32.gmra.mxu3 %v945_v8  ;;  %v946_v31 = vadd.f32 %v1273_v29, %v1619_v20 }
 0x436   :  { %1018 = vmatmul.f32.gmra.mxu2 %v946_v31 }
 0x439   :  { %v1275_v25 = vpop.eup %1274 }
 0x43a   :  { %v947_v32 = vadd.f32 %v1275_v25, %v1637_v30 }
 0x43c   :  { %1053 = vmatmul.f32.gmra.mxu3 %v947_v32 }
 0x491   :  { %v1004_v33 = vpop.f32.mrf.mxu2 }
 0x497   :  { %v1039_v34 = vpop.f32.mrf.mxu3 }
 0x498   :  { %v1040_v46 = vadd.f32 %v1039_v34, %v1004_v33 }
 0x499   :  { %v1007_v16 = vpop.f32.mrf.mxu2 }
 0x49f   :  { %v1042_v35 = vpop.f32.mrf.mxu3 }
 0x4a0   :  { %v1043_v30 = vadd.f32 %v1042_v35, %v1007_v16 }
 0x4a1   :  { %v1010_v36 = vpop.f32.mrf.mxu2 }
 0x4a7   :  { %v1045_v37 = vpop.f32.mrf.mxu3 }
 0x4a8   :  { %v1046_v45 = vadd.f32 %v1045_v37, %v1010_v36 }
 0x4a9   :  { %v1013_v38 = vpop.f32.mrf.mxu2 }
 0x4af   :  { %v1048_v39 = vpop.f32.mrf.mxu3 }
 0x4b0   :  { %v1049_v20 = vadd.f32 %v1048_v39, %v1013_v38 }
 0x4b1   :  { %v1016_v40 = vpop.f32.mrf.mxu2 }
 0x4b7   :  { %v1051_v28 = vpop.f32.mrf.mxu3 }
 0x4b8   :  { %v1052_v44 = vadd.f32 %v1051_v28, %v1016_v40 }
 0x4b9   :  { %v1019_v41 = vpop.f32.mrf.mxu2 }
 0x4bf   :  { %v1054_v42 = vpop.f32.mrf.mxu3 }
 0x4c0   :  { %v1055_v43 = vadd.f32 %v1054_v42, %v1019_v41 }
 0x4c2   :  { %1088 = vmatpush.msra.mxu0 %v1055_v43 }
 0x4c4   :  { %1089 = vmatpush.msra.mxu0 %v1052_v44 }
 0x4c6   :  { %1090 = vmatpush.msra.mxu0 %v1049_v20 }
 0x4c8   :  { %1091 = vmatpush.msra.mxu0 %v1046_v45 }
 0x4ca   :  { %1092 = vmatpush.msra.mxu0 %v1043_v30 }
 0x4cc   :  { %1093 = vmatpush.msra.mxu0 %v1040_v46 }
 0x4cd   :  { %1174 = vmatmul.msk.f32.vlgmr.msra.gmra.mxu0 %vm200_vm0, %v948_v47 }
 0x4d5   :  { %1175 = vmatmul.msk.f32.gmra.mxu0 %vm200_vm0, %v949_v48 }
 0x4dd   :  { %1176 = vmatmul.msk.f32.gmra.mxu0 %vm200_vm0, %v950_v49 }
 0x4e5   :  { %1177 = vmatmul.msk.f32.gmra.mxu0 %vm200_vm0, %v951_v50 }
 0x4ed   :  { %1178 = vmatmul.msk.f32.gmra.mxu0 %vm200_vm0, %v952_v51 }
 0x4f5   :  { %1179 = vmatmul.msk.f32.gmra.mxu0 %vm200_vm0, %v953_v52 }
 0x54a   :  { %v1095_v54 = vpop.f32.mrf.mxu0 }
 0x54b   :  { %v1096_v55 = vadd.f32 %v1203_v53, %v1095_v54 }
 0x54d   :  { %v1113_v57 = vadd.f32 %v1276_v56, %v1096_v55 }
 0x54f   :  { %1119 = vst [vmem:[%s1870_s10] sm:$0xff] %v1113_v57 }
 0x552   :  { %v1098_v58 = vpop.f32.mrf.mxu0 }
 0x553   :  { %v1099_v59 = vadd.f32 %v1203_v53, %v1098_v58 }
 0x555   :  { %v1114_v62 = vadd.f32 %v1277_v61, %v1099_v59 }
 0x557   :  { %1120 = vst [vmem:[%s1870_s10 + $0x8] sm:$0xff] %v1114_v62 }
 0x55a   :  { %v1101_v63 = vpop.f32.mrf.mxu0 }
 0x55b   :  { %v1102_v1 = vadd.f32 %v1203_v53, %v1101_v63 }
 0x55d   :  { %v1115_v2 = vadd.f32 %v1278_v60, %v1102_v1 }
 0x55f   :  { %1121 = vst [vmem:[%s1870_s10 + $0x10] sm:$0xff] %v1115_v2 }
 0x562   :  { %v1104_v4 = vpop.f32.mrf.mxu0 }
 0x563   :  { %v1105_v5 = vadd.f32 %v1203_v53, %v1104_v4 }
 0x565   :  { %v1116_v6 = vadd.f32 %v1279_v13, %v1105_v5 }
 0x567   :  { %1122 = vst [vmem:[%s1870_s10 + $0x18] sm:$0xff] %v1116_v6 }
 0x56a   :  { %v1107_v7 = vpop.f32.mrf.mxu0 }
 0x56b   :  { %v1108_v9 = vadd.f32 %v1203_v53, %v1107_v7 }
 0x56d   :  { %v1117_v10 = vadd.f32 %v1280_v0, %v1108_v9 }
 0x56f   :  { %1123 = vst [vmem:[%s1870_s10 + $0x20] sm:$0xff] %v1117_v10 }
 0x572   :  { %v1110_v11 = vpop.f32.mrf.mxu0 }
 0x573   :  { %v1111_v12 = vadd.f32 %v1203_v53, %v1110_v11 }
 0x575   :  { %v1118_v14 = vadd.f32 %v1281_v18, %v1111_v12 }
 0x577   :  { %1124 = vst [vmem:[%s1870_s10 + $0x28] sm:$0xff] %v1118_v14 }
 0x578   :  { %1129 = vsyncpa [#allocation3], 1 }
 0x579   :  { %1130 = vsyncpa [#allocation5], 1 }

</bundles_post_ra>
